<compile_context>
chip_gen: v7x
topology: tpu7x:2x2x1
jax: 0.10.0
libtpu: 0.0.40
codegen_flags: <defaults>
</compile_context>

<pallas_src>
import math

import jax
import jax.numpy as jnp
from jax.experimental import pallas as pl
from jax.experimental.pallas import tpu as pltpu

D_IN, D_H = 784, 400                   # logical (PyTorch) dims
D_IN_P, D_H_P, DZ_P = 896, 512, 128    # lane-aligned padded dims (multiples of 128)
KC_MAX = 4                             # decode samples per chunk (caps h2/y VMEM)


def _round_up(n, m):
    return (n + m - 1) // m * m


def _pad2(a, shape):
    out = jnp.zeros(shape, a.dtype)
    return out.at[: a.shape[0], : a.shape[1]].set(a)


# ----------------------------- kernel -------------------------------------- #

def _make_vae_kernel(TB, K, plain):
    """Build the fused kernel for static (tile rows, K, plain-path) config."""
    KC = min(K, KC_MAX)

    def kernel(x_ref, eps_ref, eps_k_ref, mask_ref,
               w1_ref, b1_ref, wh_ref, bh_ref,
               w3_ref, b3_ref, w4_ref, b4_ref,
               ml_ref, out_ref):
        wd = w1_ref.dtype  # bf16

        # ---- encoder: Linear(784->400)+ReLU, fused mean|logvar heads -------
        h = jnp.dot(x_ref[...], w1_ref[...],
                    preferred_element_type=jnp.float32) + b1_ref[...]
        h = jnp.maximum(h, 0.0).astype(wd)            # fused ReLU + bf16 cast
        ml = jnp.dot(h, wh_ref[...],
                     preferred_element_type=jnp.float32) + bh_ref[...]
        ml_ref[...] = ml                              # packed [mean | logvar]

        mean = ml[:, :DZ_P]
        logvar = ml[:, DZ_P:]

        # ---- reparametrize: eps is one (1, DZ_P) vector broadcast over rows
        std = jnp.exp(0.5 * logvar)
        z = eps_ref[...] * std + mean                 # (TB, DZ_P) f32

        def decode(zc):                               # Linear+ReLU, Linear+tanh
            h2 = jnp.dot(zc, w3_ref[...],
                         preferred_element_type=jnp.float32) + b3_ref[...]
            h2 = jnp.maximum(h2, 0.0).astype(wd)      # fused ReLU + bf16 cast
            return jnp.tanh(jnp.dot(h2, w4_ref[...],
                                    preferred_element_type=jnp.float32)
                            + b4_ref[...])

        if plain:
            # del_features == [] : single decode of z, no slab / select work.
            out_ref[...] = decode(z.astype(wd)).astype(out_ref.dtype)
            return

        # ---- K masked z-copies, decoded in chunks of <= KC samples ---------
        keep = jnp.broadcast_to(mask_ref[...] == 0.0, (TB, DZ_P))  # hoisted
        acc = jnp.zeros((TB, D_IN_P), jnp.float32)
        # TODO(synk): for very large K, replace this static chunk unroll with
        # a lax.fori_loop over chunks to bound code size.
        for c0 in range(0, K, KC):                    # static chunk loop
            kc = min(KC, K - c0)
            slabs = [jnp.where(keep, z, eps_k_ref[k:k + 1, :] * std + mean)
                     for k in range(c0, c0 + kc)]
            zc = jnp.concatenate(slabs, axis=0).astype(wd)   # (kc*TB, DZ_P)
            y = decode(zc)                                   # (kc*TB, D_IN_P)
            for k in range(kc):
                acc = acc + y[k * TB:(k + 1) * TB, :]
        out_ref[...] = (acc * (1.0 / K)).astype(out_ref.dtype)

    return kernel


# ----------------------------- wrapper -------------------------------------- #

def _draw_noise(key, dz, del_features, K):
    """Host-side RNG matching torch.randn(dim_z) semantics (vector eps)."""
    key, k1 = jax.random.split(key)
    eps = jnp.zeros((1, DZ_P), jnp.float32).at[0, :dz].set(
        jax.random.normal(k1, (dz,), jnp.float32))
    if len(del_features) == 0:
        return (eps, jnp.zeros((1, DZ_P), jnp.float32),
                jnp.zeros((1, DZ_P), jnp.float32), 1, True)
    assert all(0 <= int(f) < dz for f in del_features), \
        "del_features indices must be < dim_z"
    key, k2 = jax.random.split(key)
    K = int(K)
    eps_k = jnp.zeros((K, DZ_P), jnp.float32).at[:, :dz].set(
        jax.random.normal(k2, (K, dz), jnp.float32))
    mask = jnp.zeros((1, DZ_P), jnp.float32).at[
        0, jnp.asarray(list(del_features), jnp.int32)].set(1.0)
    return eps, eps_k, mask, K, False


def _vae_pallas(x, p, eps, eps_k, mask, K, plain):
    B = x.shape[0]
    wd = p["w1"].dtype

    # TB <= 128 so batches > 128 rows give a grid of >= 2 'parallel' steps
    # (v7x megacore can shard); v5e/v6e are unaffected (1 TC).
    TB = min(128, _round_up(B, 8))
    B_pad = _round_up(B, TB)
    x_pad = jnp.zeros((B_pad, D_IN_P), wd).at[:B, :D_IN].set(x.astype(wd))

    def row_spec(cols):
        return pl.BlockSpec((TB, cols), lambda i: (i, 0))

    def resident(shape):
        # Grid-invariant blocks (weights / noise) stay resident in VMEM.
        # TODO(synk): pipeline_mode=pl.Buffered(1) would drop their second
        # pipeline buffer (~2 MiB); omitted to keep compilation conservative.
        nd = len(shape)
        return pl.BlockSpec(shape, lambda i, _n=nd: (0,) * _n)

    ins = (x_pad, eps, eps_k, mask,
           p["w1"], p["b1"], p["wh"], p["bh"],
           p["w3"], p["b3"], p["w4"], p["b4"])
    in_specs = [row_spec(D_IN_P)] + [resident(a.shape) for a in ins[1:]]

    K_dec = 1 if plain else K
    flops = (2 * B_pad * (D_IN_P * D_H_P + D_H_P * 2 * DZ_P)
             + 2 * B_pad * K_dec * (DZ_P * D_H_P + D_H_P * D_IN_P))
    transcendentals = B_pad * DZ_P + B_pad * K_dec * D_IN_P        # exp + tanh
    bytes_accessed = (sum(int(a.size) * a.dtype.itemsize for a in ins)
                      + B_pad * (2 * DZ_P * 4 + D_IN_P * 2))       # ml f32, out bf16

    kernel = _make_vae_kernel(TB, K, plain)
    ml, out = pl.pallas_call(
        kernel,
        out_shape=(jax.ShapeDtypeStruct((B_pad, 2 * DZ_P), jnp.float32),
                   jax.ShapeDtypeStruct((B_pad, D_IN_P), jnp.bfloat16)),
        grid=(B_pad // TB,),
        in_specs=in_specs,
        out_specs=(row_spec(2 * DZ_P), row_spec(D_IN_P)),
        compiler_params=pltpu.CompilerParams(
            dimension_semantics=("parallel",),
            vmem_limit_bytes=64 * 1024 * 1024),
        cost_estimate=pl.CostEstimate(flops=flops,
                                      transcendentals=transcendentals,
                                      bytes_accessed=bytes_accessed),
    )(*ins)
    return ml[:B], out[:B]


def vae_forward(x, params, key, del_features=(), K=1):
    """Mirrors VAE.forward(x, del_features, K); returns (fake_img, mean, logvar)."""
    dz = params["dim_z"]
    eps, eps_k, mask, K_eff, plain = _draw_noise(key, dz, del_features, K)
    ml, out = _vae_pallas(x, params, eps, eps_k, mask, K_eff, plain)
    fake = out[:, :D_IN]                 # bf16 reconstructed image
    mean = ml[:, :dz]
    logvar = ml[:, DZ_P:DZ_P + dz]
    return fake, mean, logvar


# ----------------------------- params & reference --------------------------- #

def init_params(key, dim_z):
    """nn.Linear-style init U(-1/sqrt(fan_in), 1/sqrt(fan_in)), unpadded f32."""
    def linear(k, fan_in, fan_out):
        kw, kb = jax.random.split(k)
        bound = 1.0 / math.sqrt(fan_in)
        w = jax.random.uniform(kw, (fan_in, fan_out), jnp.float32, -bound, bound)
        b = jax.random.uniform(kb, (1, fan_out), jnp.float32, -bound, bound)
        return w, b

    ks = jax.random.split(key, 5)
    raw = {"dim_z": dim_z}
    raw["w1"], raw["b1"] = linear(ks[0], D_IN, D_H)       # encode_layer1
    raw["w21"], raw["b21"] = linear(ks[1], D_H, dim_z)    # encode_layer2_1
    raw["w22"], raw["b22"] = linear(ks[2], D_H, dim_z)    # encode_layer2_2
    raw["w3"], raw["b3"] = linear(ks[3], dim_z, D_H)      # decode_layer1
    raw["w4"], raw["b4"] = linear(ks[4], D_H, D_IN)       # decode_layer2
    return raw


def prepare_params(raw, weight_dtype=jnp.bfloat16):
    """Zero-pad to lane-aligned shapes, fuse encoder heads, cast weights to bf16."""
    p = {"dim_z": raw["dim_z"]}
    p["w1"] = _pad2(raw["w1"], (D_IN_P, D_H_P)).astype(weight_dtype)
    p["b1"] = _pad2(raw["b1"], (1, D_H_P))
    p["wh"] = jnp.concatenate([_pad2(raw["w21"], (D_H_P, DZ_P)),
                               _pad2(raw["w22"], (D_H_P, DZ_P))], axis=1
                              ).astype(weight_dtype)
    p["bh"] = jnp.concatenate([_pad2(raw["b21"], (1, DZ_P)),
                               _pad2(raw["b22"], (1, DZ_P))], axis=1)
    p["w3"] = _pad2(raw["w3"], (DZ_P, D_H_P)).astype(weight_dtype)
    p["b3"] = _pad2(raw["b3"], (1, D_H_P))
    p["w4"] = _pad2(raw["w4"], (D_H_P, D_IN_P)).astype(weight_dtype)
    p["b4"] = _pad2(raw["b4"], (1, D_IN_P))
    return p


def _reference_forward(x, p, eps, eps_k, mask, K):
    """Pure-JAX reference on the same padded bf16 weights (sanity check)."""
    wd = p["w1"].dtype
    xp = jnp.zeros((x.shape[0], D_IN_P), jnp.float32).at[:, :D_IN].set(x)
    h = jnp.maximum(jnp.dot(xp.astype(wd), p["w1"],
                            preferred_element_type=jnp.float32) + p["b1"], 0.0)
    ml = jnp.dot(h.astype(wd), p["wh"],
                 preferred_element_type=jnp.float32) + p["bh"]
    mean, logvar = ml[:, :DZ_P], ml[:, DZ_P:]
    std = jnp.exp(0.5 * logvar)
    z = eps * std + mean
    acc = jnp.zeros((x.shape[0], D_IN_P), jnp.float32)
    for k in range(K):
        zc = jnp.where(mask == 0.0, z, eps_k[k:k + 1] * std + mean)
        h2 = jnp.maximum(jnp.dot(zc.astype(wd), p["w3"],
                                 preferred_element_type=jnp.float32) + p["b3"], 0.0)
        acc = acc + jnp.tanh(jnp.dot(h2.astype(wd), p["w4"],
                                     preferred_element_type=jnp.float32) + p["b4"])
    out = acc / K
    dz = p["dim_z"]
    return out[:, :D_IN], mean[:, :dz], logvar[:, :dz]


if __name__ == "__main__":
    key = jax.random.PRNGKey(0)
    k_param, k_x, k_fwd1, k_fwd2 = jax.random.split(key, 4)

    dim_z = 16
    B = 2
    params = prepare_params(init_params(k_param, dim_z))
    x = jax.random.normal(k_x, (B, D_IN), dtype=jnp.float32)

    # Branch 1: del_features == []  ->  single decode of z
    fake, mean, logvar = vae_forward(x, params, k_fwd1, del_features=(), K=1)
    jax.block_until_ready((fake, mean, logvar))
    assert fake.shape == (B, D_IN) and mean.shape == (B, dim_z) and logvar.shape == (B, dim_z)
    assert bool(jnp.all(jnp.isfinite(fake.astype(jnp.float32))))
    eps1, epsk1, mask1, K1, _ = _draw_noise(k_fwd1, dim_z, (), 1)
    rf, rm, rl = _reference_forward(x, params, eps1, epsk1, mask1, K1)
    assert bool(jnp.allclose(fake.astype(jnp.float32), rf, atol=3e-2, rtol=3e-2))
    assert bool(jnp.allclose(mean, rm, atol=3e-2, rtol=3e-2))
    assert bool(jnp.allclose(logvar, rl, atol=3e-2, rtol=3e-2))

    # Branch 2: replace latent features {1, 3} with fresh samples, average K decodes
    fake2, mean2, logvar2 = vae_forward(x, params, k_fwd2, del_features=(1, 3), K=4)
    jax.block_until_ready((fake2, mean2, logvar2))
    assert fake2.shape == (B, D_IN)
    assert bool(jnp.all(jnp.isfinite(fake2.astype(jnp.float32))))
    eps2, epsk2, mask2, K2, _ = _draw_noise(k_fwd2, dim_z, (1, 3), 4)
    rf2, _, _ = _reference_forward(x, params, eps2, epsk2, mask2, K2)
    assert bool(jnp.allclose(fake2.astype(jnp.float32), rf2, atol=3e-2, rtol=3e-2))

    print("KERNEL_OK")
</pallas_src>

<mosaic_0001>
module attributes {stable_mosaic.version = 11 : i64} {
  func.func @kernel(%arg0: i32, %arg1: memref<8x896xbf16, #tpu.memory_space<vmem>>, %arg2: memref<1x128xf32, #tpu.memory_space<vmem>>, %arg3: memref<1x128xf32, #tpu.memory_space<vmem>>, %arg4: memref<1x128xf32, #tpu.memory_space<vmem>>, %arg5: memref<896x512xbf16, #tpu.memory_space<vmem>>, %arg6: memref<1x512xf32, #tpu.memory_space<vmem>>, %arg7: memref<512x256xbf16, #tpu.memory_space<vmem>>, %arg8: memref<1x256xf32, #tpu.memory_space<vmem>>, %arg9: memref<128x512xbf16, #tpu.memory_space<vmem>>, %arg10: memref<1x512xf32, #tpu.memory_space<vmem>>, %arg11: memref<512x896xbf16, #tpu.memory_space<vmem>>, %arg12: memref<1x896xf32, #tpu.memory_space<vmem>>, %arg13: memref<8x256xf32, #tpu.memory_space<vmem>>, %arg14: memref<8x896xbf16, #tpu.memory_space<vmem>>) attributes {dimension_semantics = [#tpu.dimension_semantics<parallel>], iteration_bounds = array<i64: 1>, scalar_prefetch = 0 : i64, scratch_operands = 0 : i64, tpu.core_type = #tpu.core_type<tc>, window_params = [{transform_indices = @transform_0, window_bounds = array<i64: 8, 896>}, {pipeline_mode = #tpu.pipeline_mode<synchronous>, transform_indices = @transform_1, window_bounds = array<i64: 1, 128>}, {pipeline_mode = #tpu.pipeline_mode<synchronous>, transform_indices = @transform_2, window_bounds = array<i64: 1, 128>}, {pipeline_mode = #tpu.pipeline_mode<synchronous>, transform_indices = @transform_3, window_bounds = array<i64: 1, 128>}, {pipeline_mode = #tpu.pipeline_mode<synchronous>, transform_indices = @transform_4, window_bounds = array<i64: 896, 512>}, {pipeline_mode = #tpu.pipeline_mode<synchronous>, transform_indices = @transform_5, window_bounds = array<i64: 1, 512>}, {pipeline_mode = #tpu.pipeline_mode<synchronous>, transform_indices = @transform_6, window_bounds = array<i64: 512, 256>}, {pipeline_mode = #tpu.pipeline_mode<synchronous>, transform_indices = @transform_7, window_bounds = array<i64: 1, 256>}, {pipeline_mode = #tpu.pipeline_mode<synchronous>, transform_indices = @transform_8, window_bounds = array<i64: 128, 512>}, {pipeline_mode = #tpu.pipeline_mode<synchronous>, transform_indices = @transform_9, window_bounds = array<i64: 1, 512>}, {pipeline_mode = #tpu.pipeline_mode<synchronous>, transform_indices = @transform_10, window_bounds = array<i64: 512, 896>}, {pipeline_mode = #tpu.pipeline_mode<synchronous>, transform_indices = @transform_11, window_bounds = array<i64: 1, 896>}, {transform_indices = @transform_12, window_bounds = array<i64: 8, 256>}, {transform_indices = @transform_13, window_bounds = array<i64: 8, 896>}]} {
    %c0 = arith.constant 0 : index
    %c0_0 = arith.constant 0 : index
    %0 = vector.load %arg1[%c0, %c0_0] : memref<8x896xbf16, #tpu.memory_space<vmem>>, vector<8x896xbf16>
    %c0_1 = arith.constant 0 : index
    %c0_2 = arith.constant 0 : index
    %1 = vector.load %arg5[%c0_1, %c0_2] : memref<896x512xbf16, #tpu.memory_space<vmem>>, vector<896x512xbf16>
    %cst = arith.constant dense<0.000000e+00> : vector<8x512xf32>
    %2 = tpu.matmul %0, %1, %cst {dimension_numbers = #tpu.dot_dimension_numbers<[1], [0], [0], [1], [0, 0, 1, 1], [], []>} : vector<8x896xbf16>, vector<896x512xbf16>, vector<8x512xf32> -> vector<8x512xf32>
    %c0_3 = arith.constant 0 : index
    %c0_4 = arith.constant 0 : index
    %3 = vector.load %arg6[%c0_3, %c0_4] : memref<1x512xf32, #tpu.memory_space<vmem>>, vector<1x512xf32>
    %4 = vector.broadcast %3 : vector<1x512xf32> to vector<8x512xf32>
    %5 = arith.addf %2, %4 : vector<8x512xf32>
    %cst_5 = arith.constant 0.000000e+00 : f32
    %6 = vector.broadcast %cst_5 : f32 to vector<8x512xf32>
    %7 = arith.maximumf %5, %6 : vector<8x512xf32>
    %8 = arith.truncf %7 : vector<8x512xf32> to vector<8x512xbf16>
    %c0_6 = arith.constant 0 : index
    %c0_7 = arith.constant 0 : index
    %9 = vector.load %arg7[%c0_6, %c0_7] : memref<512x256xbf16, #tpu.memory_space<vmem>>, vector<512x256xbf16>
    %cst_8 = arith.constant dense<0.000000e+00> : vector<8x256xf32>
    %10 = tpu.matmul %8, %9, %cst_8 {dimension_numbers = #tpu.dot_dimension_numbers<[1], [0], [0], [1], [0, 0, 1, 1], [], []>} : vector<8x512xbf16>, vector<512x256xbf16>, vector<8x256xf32> -> vector<8x256xf32>
    %c0_9 = arith.constant 0 : index
    %c0_10 = arith.constant 0 : index
    %11 = vector.load %arg8[%c0_9, %c0_10] : memref<1x256xf32, #tpu.memory_space<vmem>>, vector<1x256xf32>
    %12 = vector.broadcast %11 : vector<1x256xf32> to vector<8x256xf32>
    %13 = arith.addf %10, %12 : vector<8x256xf32>
    %c0_11 = arith.constant 0 : index
    %c0_12 = arith.constant 0 : index
    %14 = vector.load %arg13[%c0_11, %c0_12] : memref<8x256xf32, #tpu.memory_space<vmem>>, vector<8x256xf32>
    tpu.vector_store %arg13[%c0_11, %c0_12], %13 {strides = array<i32>} : memref<8x256xf32, #tpu.memory_space<vmem>>, vector<8x256xf32>,
    %15 = vector.extract_strided_slice %13 {offsets = [0, 0], sizes = [8, 128], strides = [1, 1]} : vector<8x256xf32> to vector<8x128xf32>
    %16 = vector.extract_strided_slice %13 {offsets = [0, 128], sizes = [8, 128], strides = [1, 1]} : vector<8x256xf32> to vector<8x128xf32>
    %cst_13 = arith.constant 5.000000e-01 : f32
    %17 = vector.broadcast %cst_13 : f32 to vector<8x128xf32>
    %18 = arith.mulf %17, %16 : vector<8x128xf32>
    %19 = math.exp %18 : vector<8x128xf32>
    %c0_14 = arith.constant 0 : index
    %c0_15 = arith.constant 0 : index
    %20 = vector.load %arg2[%c0_14, %c0_15] : memref<1x128xf32, #tpu.memory_space<vmem>>, vector<1x128xf32>
    %21 = vector.broadcast %20 : vector<1x128xf32> to vector<8x128xf32>
    %22 = arith.mulf %21, %19 : vector<8x128xf32>
    %23 = arith.addf %22, %15 : vector<8x128xf32>
    %24 = arith.truncf %23 : vector<8x128xf32> to vector<8x128xbf16>
    %c0_16 = arith.constant 0 : index
    %c0_17 = arith.constant 0 : index
    %25 = vector.load %arg9[%c0_16, %c0_17] : memref<128x512xbf16, #tpu.memory_space<vmem>>, vector<128x512xbf16>
    %cst_18 = arith.constant dense<0.000000e+00> : vector<8x512xf32>
    %26 = tpu.matmul %24, %25, %cst_18 {dimension_numbers = #tpu.dot_dimension_numbers<[1], [0], [0], [1], [0, 0, 1, 1], [], []>} : vector<8x128xbf16>, vector<128x512xbf16>, vector<8x512xf32> -> vector<8x512xf32>
    %c0_19 = arith.constant 0 : index
    %c0_20 = arith.constant 0 : index
    %27 = vector.load %arg10[%c0_19, %c0_20] : memref<1x512xf32, #tpu.memory_space<vmem>>, vector<1x512xf32>
    %28 = vector.broadcast %27 : vector<1x512xf32> to vector<8x512xf32>
    %29 = arith.addf %26, %28 : vector<8x512xf32>
    %cst_21 = arith.constant 0.000000e+00 : f32
    %30 = vector.broadcast %cst_21 : f32 to vector<8x512xf32>
    %31 = arith.maximumf %29, %30 : vector<8x512xf32>
    %32 = arith.truncf %31 : vector<8x512xf32> to vector<8x512xbf16>
    %c0_22 = arith.constant 0 : index
    %c0_23 = arith.constant 0 : index
    %33 = vector.load %arg11[%c0_22, %c0_23] : memref<512x896xbf16, #tpu.memory_space<vmem>>, vector<512x896xbf16>
    %cst_24 = arith.constant dense<0.000000e+00> : vector<8x896xf32>
    %34 = tpu.matmul %32, %33, %cst_24 {dimension_numbers = #tpu.dot_dimension_numbers<[1], [0], [0], [1], [0, 0, 1, 1], [], []>} : vector<8x512xbf16>, vector<512x896xbf16>, vector<8x896xf32> -> vector<8x896xf32>
    %c0_25 = arith.constant 0 : index
    %c0_26 = arith.constant 0 : index
    %35 = vector.load %arg12[%c0_25, %c0_26] : memref<1x896xf32, #tpu.memory_space<vmem>>, vector<1x896xf32>
    %36 = vector.broadcast %35 : vector<1x896xf32> to vector<8x896xf32>
    %37 = arith.addf %34, %36 : vector<8x896xf32>
    %38 = math.tanh %37 : vector<8x896xf32>
    %39 = arith.truncf %38 : vector<8x896xf32> to vector<8x896xbf16>
    %c0_27 = arith.constant 0 : index
    %c0_28 = arith.constant 0 : index
    %40 = vector.load %arg14[%c0_27, %c0_28] : memref<8x896xbf16, #tpu.memory_space<vmem>>, vector<8x896xbf16>
    tpu.vector_store %arg14[%c0_27, %c0_28], %39 {strides = array<i32>} : memref<8x896xbf16, #tpu.memory_space<vmem>>, vector<8x896xbf16>,
    return
  }
  func.func @transform_0(%arg0: i32) -> (i32, i32) {
    %c0_i32 = arith.constant 0 : i32
    %c0_i32_0 = arith.constant 0 : i32
    return %arg0, %c0_i32 : i32, i32
  }
  func.func @transform_1(%arg0: i32) -> (i32, i32) {
    %c0_i32 = arith.constant 0 : i32
    %c0_i32_0 = arith.constant 0 : i32
    %c0_i32_1 = arith.constant 0 : i32
    return %c0_i32, %c0_i32_0 : i32, i32
  }
  func.func @transform_2(%arg0: i32) -> (i32, i32) {
    %c0_i32 = arith.constant 0 : i32
    %c0_i32_0 = arith.constant 0 : i32
    %c0_i32_1 = arith.constant 0 : i32
    return %c0_i32, %c0_i32_0 : i32, i32
  }
  func.func @transform_3(%arg0: i32) -> (i32, i32) {
    %c0_i32 = arith.constant 0 : i32
    %c0_i32_0 = arith.constant 0 : i32
    %c0_i32_1 = arith.constant 0 : i32
    return %c0_i32, %c0_i32_0 : i32, i32
  }
  func.func @transform_4(%arg0: i32) -> (i32, i32) {
    %c0_i32 = arith.constant 0 : i32
    %c0_i32_0 = arith.constant 0 : i32
    %c0_i32_1 = arith.constant 0 : i32
    return %c0_i32, %c0_i32_0 : i32, i32
  }
  func.func @transform_5(%arg0: i32) -> (i32, i32) {
    %c0_i32 = arith.constant 0 : i32
    %c0_i32_0 = arith.constant 0 : i32
    %c0_i32_1 = arith.constant 0 : i32
    return %c0_i32, %c0_i32_0 : i32, i32
  }
  func.func @transform_6(%arg0: i32) -> (i32, i32) {
    %c0_i32 = arith.constant 0 : i32
    %c0_i32_0 = arith.constant 0 : i32
    %c0_i32_1 = arith.constant 0 : i32
    return %c0_i32, %c0_i32_0 : i32, i32
  }
  func.func @transform_7(%arg0: i32) -> (i32, i32) {
    %c0_i32 = arith.constant 0 : i32
    %c0_i32_0 = arith.constant 0 : i32
    %c0_i32_1 = arith.constant 0 : i32
    return %c0_i32, %c0_i32_0 : i32, i32
  }
  func.func @transform_8(%arg0: i32) -> (i32, i32) {
    %c0_i32 = arith.constant 0 : i32
    %c0_i32_0 = arith.constant 0 : i32
    %c0_i32_1 = arith.constant 0 : i32
    return %c0_i32, %c0_i32_0 : i32, i32
  }
  func.func @transform_9(%arg0: i32) -> (i32, i32) {
    %c0_i32 = arith.constant 0 : i32
    %c0_i32_0 = arith.constant 0 : i32
    %c0_i32_1 = arith.constant 0 : i32
    return %c0_i32, %c0_i32_0 : i32, i32
  }
  func.func @transform_10(%arg0: i32) -> (i32, i32) {
    %c0_i32 = arith.constant 0 : i32
    %c0_i32_0 = arith.constant 0 : i32
    %c0_i32_1 = arith.constant 0 : i32
    return %c0_i32, %c0_i32_0 : i32, i32
  }
  func.func @transform_11(%arg0: i32) -> (i32, i32) {
    %c0_i32 = arith.constant 0 : i32
    %c0_i32_0 = arith.constant 0 : i32
    %c0_i32_1 = arith.constant 0 : i32
    return %c0_i32, %c0_i32_0 : i32, i32
  }
  func.func @transform_12(%arg0: i32) -> (i32, i32) {
    %c0_i32 = arith.constant 0 : i32
    %c0_i32_0 = arith.constant 0 : i32
    return %arg0, %c0_i32 : i32, i32
  }
  func.func @transform_13(%arg0: i32) -> (i32, i32) {
    %c0_i32 = arith.constant 0 : i32
    %c0_i32_0 = arith.constant 0 : i32
    return %arg0, %c0_i32 : i32, i32
  }
}

</mosaic_0001>

<bundles_post_ra>
// kernel: tpu_custom_call.1
= control target key start
LH: loop header
LB: loop body
LE: loop exit
PB: predicated region body
PF: predicated region fallthrough
CT: control target
= control target key end

     0   :  { %19 = vsyncpa [#allocation3], 0  ;;  %s6763_s0 = inlined_call_operand.hbm [shape: bf16[8,896], index: 0, kind: input, shape index: {}]   ;;  %s6764_s1 = inlined_call_operand.hbm [shape: f32[1,128], index: 1, kind: input, shape index: {}]   ;;  %s6765_s2 = inlined_call_operand.hbm [shape: f32[1,128], index: 2, kind: input, shape index: {}]   ;;  %s6766_s3 = inlined_call_operand.hbm [shape: f32[1,128], index: 3, kind: input, shape index: {}]   ;;  %s6767_s4 = inlined_call_operand.hbm [shape: bf16[896,512], index: 4, kind: input, shape index: {}]   ;;  %s6768_s5 = inlined_call_operand.hbm [shape: f32[1,512], index: 5, kind: input, shape index: {}]   ;;  %s6769_s6 = inlined_call_operand.hbm [shape: bf16[512,256], index: 6, kind: input, shape index: {}]   ;;  %s6770_s7 = inlined_call_operand.hbm [shape: f32[1,256], index: 7, kind: input, shape index: {}]   ;;  %s6771_s8 = inlined_call_operand.hbm [shape: bf16[128,512], index: 8, kind: input, shape index: {}]   ;;  %s6772_s9 = inlined_call_operand.hbm [shape: f32[1,512], index: 9, kind: input, shape index: {}]   ;;  %s6773_s10 = inlined_call_operand.hbm [shape: bf16[512,896], index: 10, kind: input, shape index: {}]   ;;  %s6774_s11 = inlined_call_operand.hbm [shape: f32[1,896], index: 11, kind: input, shape index: {}]   ;;  %s6775_s12 = inlined_call_operand.hbm [shape: f32[8,256], index: 12, kind: output, shape index: {0}]   ;;  %s6776_s13 = inlined_call_operand.hbm [shape: bf16[8,896], index: 13, kind: output, shape index: {1}]  }
   0x1   :  { %20 = vsyncpa [#allocation6], 0 }
   0x2   :  { %21 = vsyncpa [#allocation9], 0 }
   0x3   :  { %22 = vsyncpa [#allocation12], 0 }
   0x4   :  { %23 = vsyncpa [#allocation15], 0 }
   0x5   :  { %24 = vsyncpa [#allocation18], 0 }
   0x6   :  { %25 = vsyncpa [#allocation21], 0 }
   0x7   :  { %26 = vsyncpa [#allocation4], 0 }
   0x8   :  { %27 = vsyncpa [#allocation24], 0  ;;  %s6393_s25 = smov [#allocation5]   ;;  %s6394_s27 = smov [#allocation8]  }
   0x9   :  { %s44_s26 = sshll.u32 %s6393_s25, 4  ;;  %s64_s28 = sshll.u32 %s6394_s27, 4  ;;  %s45_s26 = int_to_ptr.vmem [resolvable:$true] %s44_s26  ;;  %s65_s28 = int_to_ptr.vmem [resolvable:$true] %s64_s28 }
   0xa   :  { %s6067_s14 = scalar_lea.hbm %s6764_s1, 16 }
   0xb   :  { %p6068_p0 = scmp.ne.s32.totalorder %s6764_s1, %s6067_s14  ;;  %p6071_p1 = scmp.lt.u32.totalorder %s6067_s14, %s6764_s1 }
   0xd   :  { %p6073_p2 = pnand %p6071_p1, %p6068_p0 }
   0xf   :  { %6076 = shalt.err (!%p6073_p2)
}
  0x10   :  { %s6077_s19 = scalar_lea.vmem %s45_s26, 16  ;;  %s6081_s20 = scalar_lea.vmem %s45_s26, 32 }
  0x11   :  { %p6078_p3 = scmp.ne.s32.totalorder %s45_s26, %s6077_s19  ;;  %p6082_p4 = scmp.lt.s32.totalorder %s45_s26, %s45_s26 }
  0x12   :  { %p6083_p5 = scmp.lt.s32.totalorder %s6081_s20, %s6077_s19 }
  0x14   :  { %p6084_p6 = por %p6083_p5, %p6082_p4 }
  0x16   :  { %p6085_p7 = pnand %p6084_p6, %p6078_p3 }
  0x18   :  { %6088 = shalt.err (!%p6085_p7)
}
  0x19   :  { %47 = dma.hbm_to_vmem [thread:$0]  %s6764_s1, 16, %s45_s26, [#allocation6]  }
  0x1a   :  { %s6089_s25 = scalar_lea.hbm %s6766_s3, 16 }
  0x1b   :  { %p6090_p8 = scmp.ne.s32.totalorder %s6766_s3, %s6089_s25  ;;  %p6093_p9 = scmp.lt.u32.totalorder %s6089_s25, %s6766_s3 }
  0x1d   :  { %p6095_p10 = pnand %p6093_p9, %p6090_p8 }
  0x1f   :  { %6098 = shalt.err (!%p6095_p10)
}
  0x20   :  { %s6099_s15 = scalar_lea.vmem %s65_s28, 16  ;;  %s6103_s16 = scalar_lea.vmem %s65_s28, 32 }
  0x21   :  { %p6100_p11 = scmp.ne.s32.totalorder %s65_s28, %s6099_s15  ;;  %p6104_p12 = scmp.lt.s32.totalorder %s65_s28, %s65_s28 }
  0x22   :  { %p6105_p13 = scmp.lt.s32.totalorder %s6103_s16, %s6099_s15 }
  0x24   :  { %p6106_p0 = por %p6105_p13, %p6104_p12 }
  0x26   :  { %p6107_p1 = pnand %p6106_p0, %p6100_p11 }
  0x28   :  { %6110 = shalt.err (!%p6107_p1)
}
  0x29   :  { %67 = dma.hbm_to_vmem [thread:$0]  %s6766_s3, 16, %s65_s28, [#allocation9]  }
  0x2a   :  { %s6395_s17 = smov [#allocation11]   ;;  %s6396_s19 = smov [#allocation14]  }
  0x2b   :  { %s86_s18 = sshll.u32 %s6395_s17, 4  ;;  %s108_s20 = sshll.u32 %s6396_s19, 4  ;;  %s87_s18 = int_to_ptr.vmem [resolvable:$true] %s86_s18  ;;  %s109_s20 = int_to_ptr.vmem [resolvable:$true] %s108_s20 }
  0x2c   :  { %s6111_s23 = scalar_lea.hbm %s6768_s5, 64 }
  0x2d   :  { %p6112_p2 = scmp.ne.s32.totalorder %s6768_s5, %s6111_s23  ;;  %p6115_p3 = scmp.lt.u32.totalorder %s6111_s23, %s6768_s5 }
  0x2f   :  { %p6117_p4 = pnand %p6115_p3, %p6112_p2 }
  0x31   :  { %6120 = shalt.err (!%p6117_p4)
}
  0x32   :  { %s6121_s3 = scalar_lea.vmem %s87_s18, 64  ;;  %p6126_p6 = scmp.lt.s32.totalorder %s87_s18, %s87_s18 }
  0x33   :  { %p6122_p5 = scmp.ne.s32.totalorder %s87_s18, %s6121_s3  ;;  %p6127_p7 = scmp.lt.s32.totalorder %s6121_s3, %s6121_s3 }
  0x35   :  { %p6128_p8 = por %p6127_p7, %p6126_p6 }
  0x37   :  { %p6129_p9 = pnand %p6128_p8, %p6122_p5 }
  0x39   :  { %6132 = shalt.err (!%p6129_p9)
}
  0x3a   :  { %89 = dma.hbm_to_vmem [thread:$0]  %s6768_s5, 64, %s87_s18, [#allocation12]  }
  0x3b   :  { %s6133_s16 = scalar_lea.hbm %s6770_s7, 32 }
  0x3c   :  { %p6134_p10 = scmp.ne.s32.totalorder %s6770_s7, %s6133_s16  ;;  %p6137_p11 = scmp.lt.u32.totalorder %s6133_s16, %s6770_s7 }
  0x3e   :  { %p6139_p12 = pnand %p6137_p11, %p6134_p10 }
  0x40   :  { %6142 = shalt.err (!%p6139_p12)
}
  0x41   :  { %s6143_s21 = scalar_lea.vmem %s109_s20, 32  ;;  %p6148_p0 = scmp.lt.s32.totalorder %s109_s20, %s109_s20 }
  0x42   :  { %p6144_p13 = scmp.ne.s32.totalorder %s109_s20, %s6143_s21  ;;  %p6149_p1 = scmp.lt.s32.totalorder %s6143_s21, %s6143_s21 }
  0x44   :  { %p6150_p2 = por %p6149_p1, %p6148_p0 }
  0x46   :  { %p6151_p3 = pnand %p6150_p2, %p6144_p13 }
  0x48   :  { %6154 = shalt.err (!%p6151_p3)
}
  0x49   :  { %111 = dma.hbm_to_vmem [thread:$0]  %s6770_s7, 32, %s109_s20, [#allocation15]  }
  0x4a   :  { %s6397_s22 = smov [#allocation17]   ;;  %s6398_s24 = smov [#allocation2]  }
  0x4b   :  { %s130_s23 = sshll.u32 %s6397_s22, 4  ;;  %s34_s25 = sshll.u32 %s6398_s24, 4  ;;  %s131_s23 = int_to_ptr.vmem [resolvable:$true] %s130_s23  ;;  %s35_s25 = int_to_ptr.vmem [resolvable:$true] %s34_s25 }
  0x4c   :  { %s6155_s3 = scalar_lea.hbm %s6772_s9, 64 }
  0x4d   :  { %p6156_p4 = scmp.ne.s32.totalorder %s6772_s9, %s6155_s3  ;;  %p6159_p5 = scmp.lt.u32.totalorder %s6155_s3, %s6772_s9 }
  0x4f   :  { %p6161_p6 = pnand %p6159_p5, %p6156_p4 }
  0x51   :  { %6164 = shalt.err (!%p6161_p6)
}
  0x52   :  { %s6165_s7 = scalar_lea.vmem %s131_s23, 64  ;;  %p6170_p8 = scmp.lt.s32.totalorder %s131_s23, %s131_s23 }
  0x53   :  { %p6166_p7 = scmp.ne.s32.totalorder %s131_s23, %s6165_s7  ;;  %p6171_p9 = scmp.lt.s32.totalorder %s6165_s7, %s6165_s7 }
  0x55   :  { %p6172_p10 = por %p6171_p9, %p6170_p8 }
  0x57   :  { %p6173_p11 = pnand %p6172_p10, %p6166_p7 }
  0x59   :  { %6176 = shalt.err (!%p6173_p11)
}
  0x5a   :  { %133 = dma.hbm_to_vmem [thread:$0]  %s6772_s9, 64, %s131_s23, [#allocation18]  }
  0x5b   :  { %s6177_s17 = scalar_lea.hbm %s6763_s0, 448 }
  0x5c   :  { %p6178_p12 = scmp.ne.s32.totalorder %s6763_s0, %s6177_s17  ;;  %p6181_p13 = scmp.lt.u32.totalorder %s6177_s17, %s6763_s0 }
  0x5e   :  { %p6183_p0 = pnand %p6181_p13, %p6178_p12 }
  0x60   :  { %6186 = shalt.err (!%p6183_p0)
}
  0x61   :  { %s6187_s22 = scalar_lea.vmem %s35_s25, 448  ;;  %p6192_p2 = scmp.lt.s32.totalorder %s35_s25, %s35_s25 }
  0x62   :  { %p6188_p1 = scmp.ne.s32.totalorder %s35_s25, %s6187_s22  ;;  %p6193_p3 = scmp.lt.s32.totalorder %s6187_s22, %s6187_s22 }
  0x64   :  { %p6194_p4 = por %p6193_p3, %p6192_p2 }
  0x66   :  { %p6195_p5 = pnand %p6194_p4, %p6188_p1 }
  0x68   :  { %6198 = shalt.err (!%p6195_p5)
}
  0x69   :  { %37 = dma.hbm_to_vmem [thread:$0]  %s6763_s0, 448, %s35_s25, [#allocation3]  }
  0x6a   :  { %s6399_s24 = smov [#allocation7]   ;;  %s6400_s29 = smov [#allocation10]  }
  0x6b   :  { %s54_s27 = sshll.u32 %s6399_s24, 4  ;;  %s73_s3 = sshll.u32 %s6400_s29, 4  ;;  %s55_s27 = int_to_ptr.vmem [resolvable:$true] %s54_s27  ;;  %s6556_s3 = int_to_ptr.vmem [resolvable:$true] %s73_s3 }
  0x6c   :  { %s6199_s14 = scalar_lea.hbm %s6765_s2, 16 }
  0x6d   :  { %p6200_p6 = scmp.ne.s32.totalorder %s6765_s2, %s6199_s14  ;;  %p6203_p7 = scmp.lt.u32.totalorder %s6199_s14, %s6765_s2 }
  0x6f   :  { %p6205_p8 = pnand %p6203_p7, %p6200_p6 }
  0x71   :  { %6208 = shalt.err (!%p6205_p8)
}
  0x72   :  { %s6209_s0 = scalar_lea.vmem %s55_s27, 16  ;;  %s6213_s25 = scalar_lea.vmem %s55_s27, 32 }
  0x73   :  { %p6210_p9 = scmp.ne.s32.totalorder %s55_s27, %s6209_s0  ;;  %p6214_p10 = scmp.lt.s32.totalorder %s55_s27, %s55_s27 }
  0x74   :  { %p6215_p11 = scmp.lt.s32.totalorder %s6213_s25, %s6209_s0 }
  0x76   :  { %p6216_p12 = por %p6215_p11, %p6214_p10 }
  0x78   :  { %p6217_p13 = pnand %p6216_p12, %p6210_p9 }
  0x7a   :  { %6220 = shalt.err (!%p6217_p13)
}
  0x7b   :  { %57 = dma.hbm_to_vmem [thread:$0]  %s6765_s2, 16, %s55_s27, [#allocation6]  }
  0x7c   :  { %s6221_s21 = scalar_lea.hbm %s6767_s4, 28672 }
  0x7d   :  { %p6222_p0 = scmp.ne.s32.totalorder %s6767_s4, %s6221_s21  ;;  %p6225_p1 = scmp.lt.u32.totalorder %s6221_s21, %s6767_s4 }
  0x7f   :  { %p6227_p2 = pnand %p6225_p1, %p6222_p0 }
  0x81   :  { %6230 = shalt.err (!%p6227_p2)
}
  0x82   :  { %s6231_s23 = scalar_lea.vmem %s6556_s3, 28672  ;;  %p6236_p4 = scmp.lt.s32.totalorder %s6556_s3, %s6556_s3 }
  0x83   :  { %p6232_p3 = scmp.ne.s32.totalorder %s6556_s3, %s6231_s23  ;;  %p6237_p5 = scmp.lt.s32.totalorder %s6231_s23, %s6231_s23 }
  0x85   :  { %p6238_p6 = por %p6237_p5, %p6236_p4 }
  0x87   :  { %p6239_p7 = pnand %p6238_p6, %p6232_p3 }
  0x89   :  { %6242 = shalt.err (!%p6239_p7)
}
  0x8a   :  { %s6401_s2 = smov 256   ;;  %s6402_s24 = smov 16  }
  0x8b   :  { %79 = dma.hbm_to_vmem [thread:$0]  %s6767_s4, 28672, %s6556_s3, [#allocation9], %s6401_s2, %s6401_s2, %s6402_s24  }
  0x8c   :  { %s6403_s28 = smov [#allocation13]   ;;  %s6243_s7 = scalar_lea.hbm %s6769_s6, 8192 }
  0x8d   :  { %s95_s30 = sshll.u32 %s6403_s28, 4  ;;  %p6244_p8 = scmp.ne.s32.totalorder %s6769_s6, %s6243_s7  ;;  %s96_s30 = int_to_ptr.vmem [resolvable:$true] %s95_s30 }
  0x8e   :  { %p6247_p9 = scmp.lt.u32.totalorder %s6243_s7, %s6769_s6 }
  0x90   :  { %p6249_p10 = pnand %p6247_p9, %p6244_p8 }
  0x92   :  { %6252 = shalt.err (!%p6249_p10)
}
  0x93   :  { %s6253_s1 = scalar_lea.vmem %s96_s30, 8192  ;;  %p6258_p12 = scmp.lt.s32.totalorder %s96_s30, %s96_s30 }
  0x94   :  { %p6254_p11 = scmp.ne.s32.totalorder %s96_s30, %s6253_s1  ;;  %p6259_p13 = scmp.lt.s32.totalorder %s6253_s1, %s6253_s1 }
  0x96   :  { %p6260_p0 = por %p6259_p13, %p6258_p12 }
  0x98   :  { %p6261_p1 = pnand %p6260_p0, %p6254_p11 }
  0x9a   :  { %6264 = shalt.err (!%p6261_p1)
}
  0x9b   :  { %s6404_s4 = smov 128   ;;  %s6405_s3 = smov 8  }
  0x9c   :  { %101 = dma.hbm_to_vmem [thread:$0]  %s6769_s6, 8192, %s96_s30, [#allocation12], %s6404_s4, %s6404_s4, %s6405_s3  }
  0x9d   :  { %s6406_s19 = smov [#allocation16]   ;;  %s6407_s5 = smov [#allocation19]  }
  0x9e   :  { %s117_s21 = sshll.u32 %s6406_s19, 4  ;;  %s139_s18 = sshll.u32 %s6407_s5, 4  ;;  %s118_s21 = int_to_ptr.vmem [resolvable:$true] %s117_s21  ;;  %s140_s18 = int_to_ptr.vmem [resolvable:$true] %s139_s18 }
  0x9f   :  { %s6265_s23 = scalar_lea.hbm %s6771_s8, 4096 }
  0xa0   :  { %p6266_p2 = scmp.ne.s32.totalorder %s6771_s8, %s6265_s23  ;;  %p6269_p3 = scmp.lt.u32.totalorder %s6265_s23, %s6771_s8 }
  0xa2   :  { %p6271_p4 = pnand %p6269_p3, %p6266_p2 }
  0xa4   :  { %6274 = shalt.err (!%p6271_p4)
}
  0xa5   :  { %s6275_s6 = scalar_lea.vmem %s118_s21, 4096  ;;  %p6280_p6 = scmp.lt.s32.totalorder %s118_s21, %s118_s21 }
  0xa6   :  { %p6276_p5 = scmp.ne.s32.totalorder %s118_s21, %s6275_s6  ;;  %p6281_p7 = scmp.lt.s32.totalorder %s6275_s6, %s6275_s6 }
  0xa8   :  { %p6282_p8 = por %p6281_p7, %p6280_p6 }
  0xaa   :  { %p6283_p9 = pnand %p6282_p8, %p6276_p5 }
  0xac   :  { %6286 = shalt.err (!%p6283_p9)
}
  0xad   :  { %123 = dma.hbm_to_vmem [thread:$0]  %s6771_s8, 4096, %s118_s21, [#allocation15], %s6401_s2, %s6401_s2, %s6402_s24  }
  0xae   :  { %s6287_s16 = scalar_lea.hbm %s6773_s10, 28672 }
  0xaf   :  { %p6288_p10 = scmp.ne.s32.totalorder %s6773_s10, %s6287_s16  ;;  %p6291_p11 = scmp.lt.u32.totalorder %s6287_s16, %s6773_s10 }
  0xb1   :  { %p6293_p12 = pnand %p6291_p11, %p6288_p10 }
  0xb3   :  { %6296 = shalt.err (!%p6293_p12)
}
  0xb4   :  { %s6297_s3 = scalar_lea.vmem %s140_s18, 28672  ;;  %p6302_p0 = scmp.lt.s32.totalorder %s140_s18, %s140_s18 }
  0xb5   :  { %p6298_p13 = scmp.ne.s32.totalorder %s140_s18, %s6297_s3  ;;  %p6303_p1 = scmp.lt.s32.totalorder %s6297_s3, %s6297_s3 }
  0xb7   :  { %p6304_p2 = por %p6303_p1, %p6302_p0 }
  0xb9   :  { %p6305_p3 = pnand %p6304_p2, %p6298_p13 }
  0xbb   :  { %6308 = shalt.err (!%p6305_p3)
}
  0xbc   :  { %s6408_s8 = smov 448   ;;  %s6409_s2 = smov 28  }
  0xbd   :  { %145 = dma.hbm_to_vmem [thread:$0]  %s6773_s10, 28672, %s140_s18, [#allocation18], %s6408_s8, %s6408_s8, %s6409_s2  }
  0xbe   :  { %s6410_s17 = smov [#allocation20]   ;;  %s6309_s22 = scalar_lea.hbm %s6774_s11, 112 }
  0xbf   :  { %s152_s19 = sshll.u32 %s6410_s17, 4  ;;  %p6310_p4 = scmp.ne.s32.totalorder %s6774_s11, %s6309_s22  ;;  %s153_s19 = int_to_ptr.vmem [resolvable:$true] %s152_s19 }
  0xc0   :  { %p6313_p5 = scmp.lt.u32.totalorder %s6309_s22, %s6774_s11 }
  0xc2   :  { %p6315_p6 = pnand %p6313_p5, %p6310_p4 }
  0xc4   :  { %6318 = shalt.err (!%p6315_p6)
}
  0xc5   :  { %s6319_s28 = scalar_lea.vmem %s153_s19, 112  ;;  %s6323_s10 = scalar_lea.vmem %s153_s19, 128 }
  0xc6   :  { %p6320_p7 = scmp.ne.s32.totalorder %s153_s19, %s6319_s28  ;;  %p6324_p8 = scmp.lt.s32.totalorder %s153_s19, %s153_s19 }
  0xc7   :  { %p6325_p9 = scmp.lt.s32.totalorder %s6323_s10, %s6319_s28 }
  0xc9   :  { %p6326_p10 = por %p6325_p9, %p6324_p8 }
  0xcb   :  { %p6327_p11 = pnand %p6326_p10, %p6320_p7 }
  0xcd   :  { %6330 = shalt.err (!%p6327_p11)
}
  0xce   :  { %155 = dma.hbm_to_vmem [thread:$0]  %s6774_s11, 112, %s153_s19, [#allocation21]  }
  0xcf   :  { %6375 = dma.done.wait [#allocation3], 448  }
  0xd0   :  { %6376 = vsyncadd [#allocation3], 4294966848 }
  0xd1   :  { %6377 = dma.done.wait [#allocation6], 32  }
  0xd2   :  { %6378 = vsyncadd [#allocation6], 4294967264 }
  0xd3   :  { %6379 = dma.done.wait [#allocation9], 28688  }
  0xd4   :  { %6380 = vsyncadd [#allocation9], 4294938608 }
  0xd5   :  { %6381 = dma.done.wait [#allocation12], 8256  }
  0xd6   :  { %6382 = vsyncadd [#allocation12], 4294959040 }
  0xd7   :  { %6383 = dma.done.wait [#allocation15], 4128  }
  0xd8   :  { %6384 = vsyncadd [#allocation15], 4294963168 }
  0xd9   :  { %6385 = dma.done.wait [#allocation18], 28736  }
  0xda   :  { %6386 = vsyncadd [#allocation18], 4294938560 }
  0xdb   :  { %6387 = dma.done.wait [#allocation21], 112  }
  0xdc   :  { %6388 = vsyncadd [#allocation21], 4294967184  ;;  %v5244_v0 = vld [vmem:[#allocation10 + $0x4] ss:$16 sps:$4 sm:$0xff]   ;;  %v5246_v1 = vld [vmem:[#allocation10 + $0xc] ss:$16 sps:$4 sm:$0xff]  }
  0xdd   :  { %1588 = vmatprep.subr.bf16.mxu0 %v5244_v0  ;;  %v5248_v2 = vld [vmem:[#allocation10] ss:$16 sps:$4 sm:$0xff]   ;;  %v5249_v3 = vld [vmem:[#allocation10 + $0x8] ss:$16 sps:$4 sm:$0xff]   ;;  %1752 = vmatprep.subr.bf16.mxu1 %v5246_v1  ;;  %v5250_v4 = vld [vmem:[#allocation10 + $0x24] ss:$16 sps:$4 sm:$0xff]  }
  0xde   :  { %1589 = vmatpush1.bf16.msra.mxu0 %v5248_v2  ;;  %1753 = vmatpush1.bf16.msra.mxu1 %v5249_v3  ;;  %v5252_v5 = vld [vmem:[#allocation10 + $0x2c] ss:$16 sps:$4 sm:$0xff]   ;;  %v5254_v6 = vld [vmem:[#allocation10 + $0x20] ss:$16 sps:$4 sm:$0xff]   ;;  %v5255_v7 = vld [vmem:[#allocation10 + $0x28] ss:$16 sps:$4 sm:$0xff]  }
  0xdf   :  { %1590 = vmatprep.subr.bf16.mxu0 %v5250_v4  ;;  %1754 = vmatprep.subr.bf16.mxu1 %v5252_v5  ;;  %v5256_v8 = vld [vmem:[#allocation10 + $0x44] ss:$16 sps:$4 sm:$0xff]   ;;  %v5258_v9 = vld [vmem:[#allocation10 + $0x4c] ss:$16 sps:$4 sm:$0xff]   ;;  %v5260_v10 = vld [vmem:[#allocation10 + $0x40] ss:$16 sps:$4 sm:$0xff]  }
  0xe0   :  { %v5261_v11 = vld [vmem:[#allocation10 + $0x48] ss:$16 sps:$4 sm:$0xff]   ;;  %v5262_v12 = vld [vmem:[#allocation10 + $0x64] ss:$16 sps:$4 sm:$0xff]   ;;  %v5264_v13 = vld [vmem:[#allocation10 + $0x6c] ss:$16 sps:$4 sm:$0xff]  }
  0xe1   :  { %v5266_v14 = vld [vmem:[#allocation10 + $0x60] ss:$16 sps:$4 sm:$0xff]   ;;  %v5267_v15 = vld [vmem:[#allocation10 + $0x68] ss:$16 sps:$4 sm:$0xff]   ;;  %v5268_v16 = vld [vmem:[#allocation10 + $0x84] ss:$16 sps:$4 sm:$0xff]  }
  0xe2   :  { %1591 = vmatpush1.bf16.msra.mxu0 %v5254_v6  ;;  %1755 = vmatpush1.bf16.msra.mxu1 %v5255_v7  ;;  %v5270_v17 = vld [vmem:[#allocation10 + $0x8c] ss:$16 sps:$4 sm:$0xff]   ;;  %v5272_v18 = vld [vmem:[#allocation10 + $0x80] ss:$16 sps:$4 sm:$0xff]   ;;  %v5273_v19 = vld [vmem:[#allocation10 + $0x88] ss:$16 sps:$4 sm:$0xff]  }
  0xe3   :  { %1592 = vmatprep.subr.bf16.mxu0 %v5256_v8  ;;  %1756 = vmatprep.subr.bf16.mxu1 %v5258_v9  ;;  %v5274_v20 = vld [vmem:[#allocation10 + $0xa4] ss:$16 sps:$4 sm:$0xff]   ;;  %v5276_v21 = vld [vmem:[#allocation10 + $0xac] ss:$16 sps:$4 sm:$0xff]   ;;  %v5278_v22 = vld [vmem:[#allocation10 + $0xa0] ss:$16 sps:$4 sm:$0xff]  }
  0xe4   :  { %v5279_v23 = vld [vmem:[#allocation10 + $0xa8] ss:$16 sps:$4 sm:$0xff]   ;;  %v5280_v24 = vld [vmem:[#allocation10 + $0xc4] ss:$16 sps:$4 sm:$0xff]   ;;  %v5282_v25 = vld [vmem:[#allocation10 + $0xcc] ss:$16 sps:$4 sm:$0xff]  }
  0xe5   :  { %v5284_v26 = vld [vmem:[#allocation10 + $0xc0] ss:$16 sps:$4 sm:$0xff]   ;;  %v5285_v27 = vld [vmem:[#allocation10 + $0xc8] ss:$16 sps:$4 sm:$0xff]   ;;  %v5286_v28 = vld [vmem:[#allocation10 + $0xe4] ss:$16 sps:$4 sm:$0xff]  }
  0xe6   :  { %1593 = vmatpush1.bf16.msra.mxu0 %v5260_v10  ;;  %1757 = vmatpush1.bf16.msra.mxu1 %v5261_v11  ;;  %v5288_v29 = vld [vmem:[#allocation10 + $0xec] ss:$16 sps:$4 sm:$0xff]   ;;  %v5290_v30 = vld [vmem:[#allocation10 + $0xe0] ss:$16 sps:$4 sm:$0xff]   ;;  %v5291_v31 = vld [vmem:[#allocation10 + $0xe8] ss:$16 sps:$4 sm:$0xff]  }
  0xe7   :  { %1594 = vmatprep.subr.bf16.mxu0 %v5262_v12  ;;  %1758 = vmatprep.subr.bf16.mxu1 %v5264_v13  ;;  %v5292_v32 = vld [vmem:[#allocation10 + $0x104] ss:$16 sps:$4 sm:$0xff]   ;;  %v5294_v33 = vld [vmem:[#allocation10 + $0x10c] ss:$16 sps:$4 sm:$0xff]   ;;  %v5296_v34 = vld [vmem:[#allocation10 + $0x100] ss:$16 sps:$4 sm:$0xff]  }
  0xe8   :  { %v5297_v35 = vld [vmem:[#allocation10 + $0x108] ss:$16 sps:$4 sm:$0xff]   ;;  %v5298_v36 = vld [vmem:[#allocation10 + $0x124] ss:$16 sps:$4 sm:$0xff]   ;;  %v5300_v37 = vld [vmem:[#allocation10 + $0x12c] ss:$16 sps:$4 sm:$0xff]  }
  0xe9   :  { %v5302_v38 = vld [vmem:[#allocation10 + $0x120] ss:$16 sps:$4 sm:$0xff]   ;;  %v5303_v39 = vld [vmem:[#allocation10 + $0x128] ss:$16 sps:$4 sm:$0xff]   ;;  %v5304_v40 = vld [vmem:[#allocation10 + $0x144] ss:$16 sps:$4 sm:$0xff]  }
  0xea   :  { %1595 = vmatpush1.bf16.msra.mxu0 %v5266_v14  ;;  %1759 = vmatpush1.bf16.msra.mxu1 %v5267_v15  ;;  %v5306_v41 = vld [vmem:[#allocation10 + $0x14c] ss:$16 sps:$4 sm:$0xff]   ;;  %v5308_v42 = vld [vmem:[#allocation10 + $0x140] ss:$16 sps:$4 sm:$0xff]   ;;  %v5309_v43 = vld [vmem:[#allocation10 + $0x148] ss:$16 sps:$4 sm:$0xff]  }
  0xeb   :  { %1596 = vmatprep.subr.bf16.mxu0 %v5268_v16  ;;  %1760 = vmatprep.subr.bf16.mxu1 %v5270_v17  ;;  %v5310_v44 = vld [vmem:[#allocation10 + $0x164] ss:$16 sps:$4 sm:$0xff]   ;;  %v5312_v45 = vld [vmem:[#allocation10 + $0x16c] ss:$16 sps:$4 sm:$0xff]   ;;  %v5314_v47 = vld [vmem:[#allocation10 + $0x160] ss:$16 sps:$4 sm:$0xff]  }
  0xec   :  { %v193_v46 = vld [vmem:[#allocation2] sm:$0xff]  ;;  %v5315_v49 = vld [vmem:[#allocation10 + $0x168] ss:$16 sps:$4 sm:$0xff]   ;;  %s6412_s11 = smov [#allocation22]  }
  0xed   :  { %v4568_v48 = vcombine.high %v193_v46, %v193_v46  ;;  %v5316_v50 = vld [vmem:[#allocation10 + $0x184] ss:$16 sps:$4 sm:$0xff]   ;;  %v5318_v51 = vld [vmem:[#allocation10 + $0x18c] ss:$16 sps:$4 sm:$0xff]   ;;  %v5320_v52 = vld [vmem:[#allocation10 + $0x180] ss:$16 sps:$4 sm:$0xff]   ;;  %v4567_v4 = vcombine.low %v193_v46, %v193_v46 }
  0xee   :  { %1597 = vmatpush1.bf16.msra.mxu0 %v5272_v18  ;;  %1761 = vmatpush1.bf16.msra.mxu1 %v5273_v19  ;;  %v5321_v53 = vld [vmem:[#allocation10 + $0x188] ss:$16 sps:$4 sm:$0xff]   ;;  %v5322_v54 = vld [vmem:[#allocation10 + $0x1a4] ss:$16 sps:$4 sm:$0xff]   ;;  %v5324_v55 = vld [vmem:[#allocation10 + $0x1ac] ss:$16 sps:$4 sm:$0xff]  }
  0xef   :  { %1598 = vmatprep.subr.bf16.mxu0 %v5274_v20  ;;  %1762 = vmatprep.subr.bf16.mxu1 %v5276_v21  ;;  %v5326_v56 = vld [vmem:[#allocation10 + $0x1a0] ss:$16 sps:$4 sm:$0xff]   ;;  %v5327_v57 = vld [vmem:[#allocation10 + $0x1a8] ss:$16 sps:$4 sm:$0xff]   ;;  %v5328_v58 = vld [vmem:[#allocation10 + $0x1c4] ss:$16 sps:$4 sm:$0xff]  }
  0xf0   :  { %1620 = vmatprep.mubr.bf16.mxu0 %v4568_v48  ;;  %1784 = vmatprep.mubr.bf16.mxu1 %v4568_v48  ;;  %v5330_v59 = vld [vmem:[#allocation10 + $0x1cc] ss:$16 sps:$4 sm:$0xff]   ;;  %v5332_v60 = vld [vmem:[#allocation10 + $0x1c0] ss:$16 sps:$4 sm:$0xff]   ;;  %v5333_v61 = vld [vmem:[#allocation10 + $0x1c8] ss:$16 sps:$4 sm:$0xff]  }
  0xf1   :  { %v5334_v62 = vld [vmem:[#allocation10 + $0x1e4] ss:$16 sps:$4 sm:$0xff]   ;;  %v5336_v63 = vld [vmem:[#allocation10 + $0x1ec] ss:$16 sps:$4 sm:$0xff]   ;;  %v5338_v0 = vld [vmem:[#allocation10 + $0x1e0] ss:$16 sps:$4 sm:$0xff]  }
  0xf2   :  { %1599 = vmatpush1.bf16.msra.mxu0 %v5278_v22  ;;  %1763 = vmatpush1.bf16.msra.mxu1 %v5279_v23  ;;  %v5339_v1 = vld [vmem:[#allocation10 + $0x1e8] ss:$16 sps:$4 sm:$0xff]   ;;  %v5344_v2 = vld [vmem:[#allocation10 + $0x204] ss:$16 sps:$4 sm:$0xff]   ;;  %v5347_v3 = vld [vmem:[#allocation10 + $0x20c] ss:$16 sps:$4 sm:$0xff]  }
  0xf3   :  { %1600 = vmatprep.subr.bf16.mxu0 %v5280_v24  ;;  %1764 = vmatprep.subr.bf16.mxu1 %v5282_v25  ;;  %v5342_v5 = vld [vmem:[#allocation10 + $0x200] ss:$16 sps:$4 sm:$0xff]   ;;  %v5345_v6 = vld [vmem:[#allocation10 + $0x208] ss:$16 sps:$4 sm:$0xff]   ;;  %v5350_v7 = vld [vmem:[#allocation10 + $0x224] ss:$16 sps:$4 sm:$0xff]  }
  0xf4   :  { %v5353_v8 = vld [vmem:[#allocation10 + $0x22c] ss:$16 sps:$4 sm:$0xff]   ;;  %v5348_v9 = vld [vmem:[#allocation10 + $0x220] ss:$16 sps:$4 sm:$0xff]   ;;  %v5351_v10 = vld [vmem:[#allocation10 + $0x228] ss:$16 sps:$4 sm:$0xff]  }
  0xf5   :  { %v5356_v11 = vld [vmem:[#allocation10 + $0x244] ss:$16 sps:$4 sm:$0xff]   ;;  %v5359_v12 = vld [vmem:[#allocation10 + $0x24c] ss:$16 sps:$4 sm:$0xff]   ;;  %v5354_v13 = vld [vmem:[#allocation10 + $0x240] ss:$16 sps:$4 sm:$0xff]  }
  0xf6   :  { %1601 = vmatpush1.bf16.msra.mxu0 %v5284_v26  ;;  %1765 = vmatpush1.bf16.msra.mxu1 %v5285_v27  ;;  %v5357_v14 = vld [vmem:[#allocation10 + $0x248] ss:$16 sps:$4 sm:$0xff]   ;;  %v5362_v15 = vld [vmem:[#allocation10 + $0x264] ss:$16 sps:$4 sm:$0xff]   ;;  %v5365_v16 = vld [vmem:[#allocation10 + $0x26c] ss:$16 sps:$4 sm:$0xff]  }
  0xf7   :  { %1602 = vmatprep.subr.bf16.mxu0 %v5286_v28  ;;  %1766 = vmatprep.subr.bf16.mxu1 %v5288_v29  ;;  %v5360_v17 = vld [vmem:[#allocation10 + $0x260] ss:$16 sps:$4 sm:$0xff]   ;;  %v5363_v18 = vld [vmem:[#allocation10 + $0x268] ss:$16 sps:$4 sm:$0xff]   ;;  %v5368_v19 = vld [vmem:[#allocation10 + $0x284] ss:$16 sps:$4 sm:$0xff]  }
  0xf8   :  { %v5371_v20 = vld [vmem:[#allocation10 + $0x28c] ss:$16 sps:$4 sm:$0xff]   ;;  %v5366_v21 = vld [vmem:[#allocation10 + $0x280] ss:$16 sps:$4 sm:$0xff]   ;;  %v5369_v22 = vld [vmem:[#allocation10 + $0x288] ss:$16 sps:$4 sm:$0xff]  }
  0xf9   :  { %v5374_v23 = vld [vmem:[#allocation10 + $0x2a4] ss:$16 sps:$4 sm:$0xff]   ;;  %v5377_v24 = vld [vmem:[#allocation10 + $0x2ac] ss:$16 sps:$4 sm:$0xff]   ;;  %v5372_v25 = vld [vmem:[#allocation10 + $0x2a0] ss:$16 sps:$4 sm:$0xff]  }
  0xfa   :  { %1603 = vmatpush1.bf16.msra.mxu0 %v5290_v30  ;;  %1767 = vmatpush1.bf16.msra.mxu1 %v5291_v31  ;;  %v5375_v26 = vld [vmem:[#allocation10 + $0x2a8] ss:$16 sps:$4 sm:$0xff]   ;;  %v5380_v27 = vld [vmem:[#allocation10 + $0x2c4] ss:$16 sps:$4 sm:$0xff]   ;;  %v5383_v28 = vld [vmem:[#allocation10 + $0x2cc] ss:$16 sps:$4 sm:$0xff]  }
  0xfb   :  { %1604 = vmatprep.subr.bf16.mxu0 %v5292_v32  ;;  %1768 = vmatprep.subr.bf16.mxu1 %v5294_v33  ;;  %v6641_v29 = vld [vmem:[#allocation2 + $0x8] sm:$0xff]  ;;  %v5378_v31 = vld [vmem:[#allocation10 + $0x2c0] ss:$16 sps:$4 sm:$0xff]   ;;  %s4538_s6 = sshll.u32 %s6412_s11, 4  ;;  %s4539_s6 = int_to_ptr.vmem [resolvable:$true] %s4538_s6 }
  0xfc   :  { %v4570_v30 = vcombine.high %v6641_v29, %v6641_v29  ;;  %v5381_v32 = vld [vmem:[#allocation10 + $0x2c8] ss:$16 sps:$4 sm:$0xff]   ;;  %v5386_v33 = vld [vmem:[#allocation10 + $0x2e4] ss:$16 sps:$4 sm:$0xff]   ;;  %v5407_v46 = vld [vmem:[#allocation10 + $0x34c] ss:$16 sps:$4 sm:$0xff]   ;;  %p6336_p13 = scmp.lt.s32.totalorder %s4539_s6, %s4539_s6 }
  0xfd   :  { %v5405_v48 = vld [vmem:[#allocation10 + $0x348] ss:$16 sps:$4 sm:$0xff]   ;;  %s6331_s30 = scalar_lea.vmem %s4539_s6, 256 }
  0xfe   :  { %1605 = vmatpush1.bf16.msra.mxu0 %v5296_v34  ;;  %1769 = vmatpush1.bf16.msra.mxu1 %v5297_v35  ;;  %v5389_v34 = vld [vmem:[#allocation10 + $0x2ec] ss:$16 sps:$4 sm:$0xff]   ;;  %v5384_v35 = vld [vmem:[#allocation10 + $0x2e0] ss:$16 sps:$4 sm:$0xff]   ;;  %p6332_p12 = scmp.ne.s32.totalorder %s4539_s6, %s6331_s30  ;;  %p6337_p0 = scmp.lt.s32.totalorder %s6331_s30, %s6331_s30 }
  0xff   :  { %1606 = vmatprep.subr.bf16.mxu0 %v5298_v36  ;;  %1770 = vmatprep.subr.bf16.mxu1 %v5300_v37  ;;  %v5387_v36 = vld [vmem:[#allocation10 + $0x2e8] ss:$16 sps:$4 sm:$0xff]   ;;  %v5392_v37 = vld [vmem:[#allocation10 + $0x304] ss:$16 sps:$4 sm:$0xff]  }
 0x100   :  { %p6338_p1 = por %p6337_p0, %p6336_p13 }
 0x102   :  { %1607 = vmatpush1.bf16.msra.mxu0 %v5302_v38  ;;  %1771 = vmatpush1.bf16.msra.mxu1 %v5303_v39  ;;  %v5395_v38 = vld [vmem:[#allocation10 + $0x30c] ss:$16 sps:$4 sm:$0xff]   ;;  %v5390_v39 = vld [vmem:[#allocation10 + $0x300] ss:$16 sps:$4 sm:$0xff]   ;;  %p6339_p2 = pnand %p6338_p1, %p6332_p12 }
 0x103   :  { %1608 = vmatprep.subr.bf16.mxu0 %v5304_v40  ;;  %1772 = vmatprep.subr.bf16.mxu1 %v5306_v41  ;;  %v5393_v40 = vld [vmem:[#allocation10 + $0x308] ss:$16 sps:$4 sm:$0xff]   ;;  %v5398_v41 = vld [vmem:[#allocation10 + $0x324] ss:$16 sps:$4 sm:$0xff]  }
 0x106   :  { %1609 = vmatpush1.bf16.msra.mxu0 %v5308_v42  ;;  %1773 = vmatpush1.bf16.msra.mxu1 %v5309_v43  ;;  %v5401_v42 = vld [vmem:[#allocation10 + $0x32c] ss:$16 sps:$4 sm:$0xff]   ;;  %v5396_v43 = vld [vmem:[#allocation10 + $0x320] ss:$16 sps:$4 sm:$0xff]  }
 0x107   :  { %1610 = vmatprep.subr.bf16.mxu0 %v5310_v44  ;;  %1774 = vmatprep.subr.bf16.mxu1 %v5312_v45  ;;  %v5399_v44 = vld [vmem:[#allocation10 + $0x328] ss:$16 sps:$4 sm:$0xff]   ;;  %v5404_v45 = vld [vmem:[#allocation10 + $0x344] ss:$16 sps:$4 sm:$0xff]  }
 0x10a   :  { %1611 = vmatpush1.bf16.msra.mxu0 %v5314_v47  ;;  %1775 = vmatpush1.bf16.msra.mxu1 %v5315_v49  ;;  %v5402_v47 = vld [vmem:[#allocation10 + $0x340] ss:$16 sps:$4 sm:$0xff]   ;;  %v5410_v49 = vld [vmem:[#allocation10 + $0x364] ss:$16 sps:$4 sm:$0xff]  }
 0x10b   :  { %1612 = vmatprep.subr.bf16.mxu0 %v5316_v50  ;;  %1776 = vmatprep.subr.bf16.mxu1 %v5318_v51  ;;  %v5413_v50 = vld [vmem:[#allocation10 + $0x36c] ss:$16 sps:$4 sm:$0xff]   ;;  %v5408_v51 = vld [vmem:[#allocation10 + $0x360] ss:$16 sps:$4 sm:$0xff]  }
 0x10e   :  { %1613 = vmatpush1.bf16.msra.mxu0 %v5320_v52  ;;  %1777 = vmatpush1.bf16.msra.mxu1 %v5321_v53  ;;  %v5411_v52 = vld [vmem:[#allocation10 + $0x368] ss:$16 sps:$4 sm:$0xff]   ;;  %v5416_v53 = vld [vmem:[#allocation10 + $0x384] ss:$16 sps:$4 sm:$0xff]  }
 0x10f   :  { %1614 = vmatprep.subr.bf16.mxu0 %v5322_v54  ;;  %1778 = vmatprep.subr.bf16.mxu1 %v5324_v55  ;;  %v5419_v54 = vld [vmem:[#allocation10 + $0x38c] ss:$16 sps:$4 sm:$0xff]   ;;  %v5414_v55 = vld [vmem:[#allocation10 + $0x380] ss:$16 sps:$4 sm:$0xff]  }
 0x112   :  { %1615 = vmatpush1.bf16.msra.mxu0 %v5326_v56  ;;  %1779 = vmatpush1.bf16.msra.mxu1 %v5327_v57  ;;  %v5417_v56 = vld [vmem:[#allocation10 + $0x388] ss:$16 sps:$4 sm:$0xff]   ;;  %v5422_v57 = vld [vmem:[#allocation10 + $0x3a4] ss:$16 sps:$4 sm:$0xff]  }
 0x113   :  { %1616 = vmatprep.subr.bf16.mxu0 %v5328_v58  ;;  %1780 = vmatprep.subr.bf16.mxu1 %v5330_v59  ;;  %v5425_v58 = vld [vmem:[#allocation10 + $0x3ac] ss:$16 sps:$4 sm:$0xff]   ;;  %v5420_v59 = vld [vmem:[#allocation10 + $0x3a0] ss:$16 sps:$4 sm:$0xff]  }
 0x116   :  { %1617 = vmatpush1.bf16.msra.mxu0 %v5332_v60  ;;  %1781 = vmatpush1.bf16.msra.mxu1 %v5333_v61  ;;  %v5423_v60 = vld [vmem:[#allocation10 + $0x3a8] ss:$16 sps:$4 sm:$0xff]   ;;  %v5428_v61 = vld [vmem:[#allocation10 + $0x3c4] ss:$16 sps:$4 sm:$0xff]  }
 0x117   :  { %1618 = vmatprep.subr.bf16.mxu0 %v5334_v62  ;;  %1782 = vmatprep.subr.bf16.mxu1 %v5336_v63  ;;  %v5431_v62 = vld [vmem:[#allocation10 + $0x3cc] ss:$16 sps:$4 sm:$0xff]   ;;  %v5426_v63 = vld [vmem:[#allocation10 + $0x3c0] ss:$16 sps:$4 sm:$0xff]  }
 0x11a   :  { %1619 = vmatpush1.bf16.msra.mxu0 %v5338_v0  ;;  %1783 = vmatpush1.bf16.msra.mxu1 %v5339_v1  ;;  %v5429_v0 = vld [vmem:[#allocation10 + $0x3c8] ss:$16 sps:$4 sm:$0xff]   ;;  %v5434_v1 = vld [vmem:[#allocation10 + $0x3e4] ss:$16 sps:$4 sm:$0xff]  }
 0x11b   :  { %1629 = vmatprep.subr.bf16.mxu0 %v5344_v2  ;;  %1793 = vmatprep.subr.bf16.mxu1 %v5347_v3  ;;  %v5437_v2 = vld [vmem:[#allocation10 + $0x3ec] ss:$16 sps:$4 sm:$0xff]   ;;  %v5432_v3 = vld [vmem:[#allocation10 + $0x3e0] ss:$16 sps:$4 sm:$0xff]  }
 0x11d   :  { %1621 = vmatmul.mubr.bf16.vlgmr.msra.gmra.mrb[0].mxu0 %v4567_v4  ;;  %1785 = vmatmul.mubr.bf16.vlgmr.msra.gmra.mrb[0].mxu1 %v4567_v4  ;;  %v5435_v4 = vld [vmem:[#allocation10 + $0x3e8] ss:$16 sps:$4 sm:$0xff]  }
 0x11e   :  { %1630 = vmatpush1.bf16.msra.mxu0 %v5342_v5  ;;  %1794 = vmatpush1.bf16.msra.mxu1 %v5345_v6  ;;  %v5442_v5 = vld [vmem:[#allocation10 + $0x404] ss:$16 sps:$4 sm:$0xff]   ;;  %v5445_v6 = vld [vmem:[#allocation10 + $0x40c] ss:$16 sps:$4 sm:$0xff]  }
 0x11f   :  { %1631 = vmatprep.subr.bf16.mxu0 %v5350_v7  ;;  %1795 = vmatprep.subr.bf16.mxu1 %v5353_v8  ;;  %v4569_v7 = vcombine.low %v6641_v29, %v6641_v29  ;;  %v5440_v8 = vld [vmem:[#allocation10 + $0x400] ss:$16 sps:$4 sm:$0xff]   ;;  %v5475_v29 = vld [vmem:[#allocation10 + $0x4ac] ss:$16 sps:$4 sm:$0xff]  }
 0x120   :  { %1661 = vmatprep.mubr.bf16.mxu0 %v4570_v30  ;;  %1825 = vmatprep.mubr.bf16.mxu1 %v4570_v30  ;;  %v5470_v30 = vld [vmem:[#allocation10 + $0x4a0] ss:$16 sps:$4 sm:$0xff]  }
 0x122   :  { %1632 = vmatpush1.bf16.msra.mxu0 %v5348_v9  ;;  %1796 = vmatpush1.bf16.msra.mxu1 %v5351_v10  ;;  %v5443_v9 = vld [vmem:[#allocation10 + $0x408] ss:$16 sps:$4 sm:$0xff]   ;;  %v5448_v10 = vld [vmem:[#allocation10 + $0x424] ss:$16 sps:$4 sm:$0xff]  }
 0x123   :  { %1633 = vmatprep.subr.bf16.mxu0 %v5356_v11  ;;  %1797 = vmatprep.subr.bf16.mxu1 %v5359_v12  ;;  %v6647_v11 = vld [vmem:[#allocation2 + $0x10] sm:$0xff] }
 0x124   :  { %v5451_v12 = vld [vmem:[#allocation10 + $0x42c] ss:$16 sps:$4 sm:$0xff]  }
 0x126   :  { %1634 = vmatpush1.bf16.msra.mxu0 %v5354_v13  ;;  %1798 = vmatpush1.bf16.msra.mxu1 %v5357_v14  ;;  %v4572_v13 = vcombine.high %v6647_v11, %v6647_v11  ;;  %v5446_v14 = vld [vmem:[#allocation10 + $0x420] ss:$16 sps:$4 sm:$0xff]  }
 0x127   :  { %1635 = vmatprep.subr.bf16.mxu0 %v5362_v15  ;;  %1799 = vmatprep.subr.bf16.mxu1 %v5365_v16  ;;  %v5449_v15 = vld [vmem:[#allocation10 + $0x428] ss:$16 sps:$4 sm:$0xff]   ;;  %v5454_v16 = vld [vmem:[#allocation10 + $0x444] ss:$16 sps:$4 sm:$0xff]  }
 0x12a   :  { %1636 = vmatpush1.bf16.msra.mxu0 %v5360_v17  ;;  %1800 = vmatpush1.bf16.msra.mxu1 %v5363_v18  ;;  %v5457_v17 = vld [vmem:[#allocation10 + $0x44c] ss:$16 sps:$4 sm:$0xff]   ;;  %v5452_v18 = vld [vmem:[#allocation10 + $0x440] ss:$16 sps:$4 sm:$0xff]  }
 0x12b   :  { %1637 = vmatprep.subr.bf16.mxu0 %v5368_v19  ;;  %1801 = vmatprep.subr.bf16.mxu1 %v5371_v20  ;;  %v5455_v19 = vld [vmem:[#allocation10 + $0x448] ss:$16 sps:$4 sm:$0xff]   ;;  %v5460_v20 = vld [vmem:[#allocation10 + $0x464] ss:$16 sps:$4 sm:$0xff]  }
 0x12e   :  { %1638 = vmatpush1.bf16.msra.mxu0 %v5366_v21  ;;  %1802 = vmatpush1.bf16.msra.mxu1 %v5369_v22  ;;  %v5463_v21 = vld [vmem:[#allocation10 + $0x46c] ss:$16 sps:$4 sm:$0xff]   ;;  %v5458_v22 = vld [vmem:[#allocation10 + $0x460] ss:$16 sps:$4 sm:$0xff]  }
 0x12f   :  { %1639 = vmatprep.subr.bf16.mxu0 %v5374_v23  ;;  %1803 = vmatprep.subr.bf16.mxu1 %v5377_v24  ;;  %v5461_v23 = vld [vmem:[#allocation10 + $0x468] ss:$16 sps:$4 sm:$0xff]   ;;  %v5466_v24 = vld [vmem:[#allocation10 + $0x484] ss:$16 sps:$4 sm:$0xff]  }
 0x132   :  { %1640 = vmatpush1.bf16.msra.mxu0 %v5372_v25  ;;  %1804 = vmatpush1.bf16.msra.mxu1 %v5375_v26  ;;  %v5469_v25 = vld [vmem:[#allocation10 + $0x48c] ss:$16 sps:$4 sm:$0xff]   ;;  %v5464_v26 = vld [vmem:[#allocation10 + $0x480] ss:$16 sps:$4 sm:$0xff]  }
 0x133   :  { %1641 = vmatprep.subr.bf16.mxu0 %v5380_v27  ;;  %1805 = vmatprep.subr.bf16.mxu1 %v5383_v28  ;;  %v5467_v27 = vld [vmem:[#allocation10 + $0x488] ss:$16 sps:$4 sm:$0xff]   ;;  %v5472_v28 = vld [vmem:[#allocation10 + $0x4a4] ss:$16 sps:$4 sm:$0xff]  }
 0x136   :  { %1642 = vmatpush1.bf16.msra.mxu0 %v5378_v31  ;;  %1806 = vmatpush1.bf16.msra.mxu1 %v5381_v32  ;;  %v5473_v31 = vld [vmem:[#allocation10 + $0x4a8] ss:$16 sps:$4 sm:$0xff]   ;;  %v5478_v32 = vld [vmem:[#allocation10 + $0x4c4] ss:$16 sps:$4 sm:$0xff]  }
 0x137   :  { %1643 = vmatprep.subr.bf16.mxu0 %v5386_v33  ;;  %1807 = vmatprep.subr.bf16.mxu1 %v5389_v34  ;;  %v5481_v33 = vld [vmem:[#allocation10 + $0x4cc] ss:$16 sps:$4 sm:$0xff]   ;;  %v5476_v34 = vld [vmem:[#allocation10 + $0x4c0] ss:$16 sps:$4 sm:$0xff]  }
 0x13a   :  { %1644 = vmatpush1.bf16.msra.mxu0 %v5384_v35  ;;  %1808 = vmatpush1.bf16.msra.mxu1 %v5387_v36  ;;  %v5479_v35 = vld [vmem:[#allocation10 + $0x4c8] ss:$16 sps:$4 sm:$0xff]   ;;  %v5484_v36 = vld [vmem:[#allocation10 + $0x4e4] ss:$16 sps:$4 sm:$0xff]  }
 0x13b   :  { %1645 = vmatprep.subr.bf16.mxu0 %v5392_v37  ;;  %1809 = vmatprep.subr.bf16.mxu1 %v5395_v38  ;;  %v5487_v37 = vld [vmem:[#allocation10 + $0x4ec] ss:$16 sps:$4 sm:$0xff]   ;;  %v5482_v38 = vld [vmem:[#allocation10 + $0x4e0] ss:$16 sps:$4 sm:$0xff]  }
 0x13e   :  { %1646 = vmatpush1.bf16.msra.mxu0 %v5390_v39  ;;  %1810 = vmatpush1.bf16.msra.mxu1 %v5393_v40  ;;  %v5485_v39 = vld [vmem:[#allocation10 + $0x4e8] ss:$16 sps:$4 sm:$0xff]   ;;  %v5490_v40 = vld [vmem:[#allocation10 + $0x504] ss:$16 sps:$4 sm:$0xff]  }
 0x13f   :  { %1647 = vmatprep.subr.bf16.mxu0 %v5398_v41  ;;  %1811 = vmatprep.subr.bf16.mxu1 %v5401_v42  ;;  %v5493_v41 = vld [vmem:[#allocation10 + $0x50c] ss:$16 sps:$4 sm:$0xff]   ;;  %v5488_v42 = vld [vmem:[#allocation10 + $0x500] ss:$16 sps:$4 sm:$0xff]  }
 0x142   :  { %1648 = vmatpush1.bf16.msra.mxu0 %v5396_v43  ;;  %1812 = vmatpush1.bf16.msra.mxu1 %v5399_v44  ;;  %v5491_v43 = vld [vmem:[#allocation10 + $0x508] ss:$16 sps:$4 sm:$0xff]   ;;  %v5496_v44 = vld [vmem:[#allocation10 + $0x524] ss:$16 sps:$4 sm:$0xff]  }
 0x143   :  { %1649 = vmatprep.subr.bf16.mxu0 %v5404_v45  ;;  %1813 = vmatprep.subr.bf16.mxu1 %v5407_v46  ;;  %v5499_v45 = vld [vmem:[#allocation10 + $0x52c] ss:$16 sps:$4 sm:$0xff]   ;;  %v5494_v46 = vld [vmem:[#allocation10 + $0x520] ss:$16 sps:$4 sm:$0xff]  }
 0x146   :  { %1650 = vmatpush1.bf16.msra.mxu0 %v5402_v47  ;;  %1814 = vmatpush1.bf16.msra.mxu1 %v5405_v48  ;;  %v5497_v47 = vld [vmem:[#allocation10 + $0x528] ss:$16 sps:$4 sm:$0xff]   ;;  %v5502_v48 = vld [vmem:[#allocation10 + $0x544] ss:$16 sps:$4 sm:$0xff]  }
 0x147   :  { %1651 = vmatprep.subr.bf16.mxu0 %v5410_v49  ;;  %1815 = vmatprep.subr.bf16.mxu1 %v5413_v50  ;;  %v5505_v49 = vld [vmem:[#allocation10 + $0x54c] ss:$16 sps:$4 sm:$0xff]   ;;  %v5500_v50 = vld [vmem:[#allocation10 + $0x540] ss:$16 sps:$4 sm:$0xff]  }
 0x14a   :  { %1652 = vmatpush1.bf16.msra.mxu0 %v5408_v51  ;;  %1816 = vmatpush1.bf16.msra.mxu1 %v5411_v52  ;;  %v5503_v51 = vld [vmem:[#allocation10 + $0x548] ss:$16 sps:$4 sm:$0xff]   ;;  %v5508_v52 = vld [vmem:[#allocation10 + $0x564] ss:$16 sps:$4 sm:$0xff]  }
 0x14b   :  { %1653 = vmatprep.subr.bf16.mxu0 %v5416_v53  ;;  %1817 = vmatprep.subr.bf16.mxu1 %v5419_v54  ;;  %v5511_v53 = vld [vmem:[#allocation10 + $0x56c] ss:$16 sps:$4 sm:$0xff]   ;;  %v5506_v54 = vld [vmem:[#allocation10 + $0x560] ss:$16 sps:$4 sm:$0xff]  }
 0x14e   :  { %1654 = vmatpush1.bf16.msra.mxu0 %v5414_v55  ;;  %1818 = vmatpush1.bf16.msra.mxu1 %v5417_v56  ;;  %v5509_v55 = vld [vmem:[#allocation10 + $0x568] ss:$16 sps:$4 sm:$0xff]   ;;  %v5514_v56 = vld [vmem:[#allocation10 + $0x584] ss:$16 sps:$4 sm:$0xff]  }
 0x14f   :  { %1655 = vmatprep.subr.bf16.mxu0 %v5422_v57  ;;  %1819 = vmatprep.subr.bf16.mxu1 %v5425_v58  ;;  %v5517_v57 = vld [vmem:[#allocation10 + $0x58c] ss:$16 sps:$4 sm:$0xff]   ;;  %v5512_v58 = vld [vmem:[#allocation10 + $0x580] ss:$16 sps:$4 sm:$0xff]  }
 0x152   :  { %1656 = vmatpush1.bf16.msra.mxu0 %v5420_v59  ;;  %1820 = vmatpush1.bf16.msra.mxu1 %v5423_v60  ;;  %v5515_v59 = vld [vmem:[#allocation10 + $0x588] ss:$16 sps:$4 sm:$0xff]   ;;  %v5520_v60 = vld [vmem:[#allocation10 + $0x5a4] ss:$16 sps:$4 sm:$0xff]  }
 0x153   :  { %1657 = vmatprep.subr.bf16.mxu0 %v5428_v61  ;;  %1821 = vmatprep.subr.bf16.mxu1 %v5431_v62  ;;  %v5523_v61 = vld [vmem:[#allocation10 + $0x5ac] ss:$16 sps:$4 sm:$0xff]   ;;  %v5518_v62 = vld [vmem:[#allocation10 + $0x5a0] ss:$16 sps:$4 sm:$0xff]  }
 0x156   :  { %1658 = vmatpush1.bf16.msra.mxu0 %v5426_v63  ;;  %1822 = vmatpush1.bf16.msra.mxu1 %v5429_v0  ;;  %v5521_v63 = vld [vmem:[#allocation10 + $0x5a8] ss:$16 sps:$4 sm:$0xff]   ;;  %v5526_v0 = vld [vmem:[#allocation10 + $0x5c4] ss:$16 sps:$4 sm:$0xff]  }
 0x157   :  { %1659 = vmatprep.subr.bf16.mxu0 %v5434_v1  ;;  %1823 = vmatprep.subr.bf16.mxu1 %v5437_v2  ;;  %v5529_v1 = vld [vmem:[#allocation10 + $0x5cc] ss:$16 sps:$4 sm:$0xff]   ;;  %v5524_v2 = vld [vmem:[#allocation10 + $0x5c0] ss:$16 sps:$4 sm:$0xff]  }
 0x15a   :  { %1660 = vmatpush1.bf16.msra.mxu0 %v5432_v3  ;;  %1824 = vmatpush1.bf16.msra.mxu1 %v5435_v4  ;;  %v5527_v3 = vld [vmem:[#allocation10 + $0x5c8] ss:$16 sps:$4 sm:$0xff]   ;;  %v5532_v4 = vld [vmem:[#allocation10 + $0x5e4] ss:$16 sps:$4 sm:$0xff]  }
 0x15b   :  { %1670 = vmatprep.subr.bf16.mxu0 %v5442_v5  ;;  %1834 = vmatprep.subr.bf16.mxu1 %v5445_v6  ;;  %v5535_v5 = vld [vmem:[#allocation10 + $0x5ec] ss:$16 sps:$4 sm:$0xff]   ;;  %v5530_v6 = vld [vmem:[#allocation10 + $0x5e0] ss:$16 sps:$4 sm:$0xff]  }
 0x15d   :  { %1662 = vmatmul.mubr.bf16.vlgmr.msra.gmra.mrb[0].mxu0 %v4569_v7  ;;  %1826 = vmatmul.mubr.bf16.vlgmr.msra.gmra.mrb[0].mxu1 %v4569_v7  ;;  %v5533_v7 = vld [vmem:[#allocation10 + $0x5e8] ss:$16 sps:$4 sm:$0xff]  }
 0x15e   :  { %1671 = vmatpush1.bf16.msra.mxu0 %v5440_v8  ;;  %1835 = vmatpush1.bf16.msra.mxu1 %v5443_v9  ;;  %v5540_v8 = vld [vmem:[#allocation10 + $0x604] ss:$16 sps:$4 sm:$0xff]   ;;  %v5543_v9 = vld [vmem:[#allocation10 + $0x60c] ss:$16 sps:$4 sm:$0xff]  }
 0x15f   :  { %1672 = vmatprep.subr.bf16.mxu0 %v5448_v10  ;;  %1836 = vmatprep.subr.bf16.mxu1 %v5451_v12  ;;  %v5538_v10 = vld [vmem:[#allocation10 + $0x600] ss:$16 sps:$4 sm:$0xff]   ;;  %v5541_v12 = vld [vmem:[#allocation10 + $0x608] ss:$16 sps:$4 sm:$0xff]  }
 0x160   :  { %1702 = vmatprep.mubr.bf16.mxu0 %v4572_v13  ;;  %1866 = vmatprep.mubr.bf16.mxu1 %v4572_v13  ;;  %v4571_v13 = vcombine.low %v6647_v11, %v6647_v11  ;;  %v5558_v11 = vld [vmem:[#allocation10 + $0x664] ss:$16 sps:$4 sm:$0xff]  }
 0x162   :  { %1673 = vmatpush1.bf16.msra.mxu0 %v5446_v14  ;;  %1837 = vmatpush1.bf16.msra.mxu1 %v5449_v15  ;;  %v5546_v14 = vld [vmem:[#allocation10 + $0x624] ss:$16 sps:$4 sm:$0xff]   ;;  %v5549_v15 = vld [vmem:[#allocation10 + $0x62c] ss:$16 sps:$4 sm:$0xff]  }
 0x163   :  { %1674 = vmatprep.subr.bf16.mxu0 %v5454_v16  ;;  %1838 = vmatprep.subr.bf16.mxu1 %v5457_v17  ;;  %v5544_v16 = vld [vmem:[#allocation10 + $0x620] ss:$16 sps:$4 sm:$0xff]   ;;  %v5547_v17 = vld [vmem:[#allocation10 + $0x628] ss:$16 sps:$4 sm:$0xff]  }
 0x166   :  { %1675 = vmatpush1.bf16.msra.mxu0 %v5452_v18  ;;  %1839 = vmatpush1.bf16.msra.mxu1 %v5455_v19  ;;  %v5552_v18 = vld [vmem:[#allocation10 + $0x644] ss:$16 sps:$4 sm:$0xff]   ;;  %v5555_v19 = vld [vmem:[#allocation10 + $0x64c] ss:$16 sps:$4 sm:$0xff]  }
 0x167   :  { %1676 = vmatprep.subr.bf16.mxu0 %v5460_v20  ;;  %1840 = vmatprep.subr.bf16.mxu1 %v5463_v21  ;;  %v5550_v20 = vld [vmem:[#allocation10 + $0x640] ss:$16 sps:$4 sm:$0xff]   ;;  %v5553_v21 = vld [vmem:[#allocation10 + $0x648] ss:$16 sps:$4 sm:$0xff]  }
 0x16a   :  { %1677 = vmatpush1.bf16.msra.mxu0 %v5458_v22  ;;  %1841 = vmatpush1.bf16.msra.mxu1 %v5461_v23  ;;  %v6411_v22 = vmov 0   ;;  %v5561_v23 = vld [vmem:[#allocation10 + $0x66c] ss:$16 sps:$4 sm:$0xff]  }
 0x16b   :  { %1678 = vmatprep.subr.bf16.mxu0 %v5466_v24  ;;  %1842 = vmatprep.subr.bf16.mxu1 %v5469_v25  ;;  %v5556_v24 = vld [vmem:[#allocation10 + $0x660] ss:$16 sps:$4 sm:$0xff]   ;;  %v5559_v25 = vld [vmem:[#allocation10 + $0x668] ss:$16 sps:$4 sm:$0xff]  }
 0x16e   :  { %1679 = vmatpush1.bf16.msra.mxu0 %v5464_v26  ;;  %1843 = vmatpush1.bf16.msra.mxu1 %v5467_v27  ;;  %v5564_v26 = vld [vmem:[#allocation10 + $0x684] ss:$16 sps:$4 sm:$0xff]   ;;  %v5567_v27 = vld [vmem:[#allocation10 + $0x68c] ss:$16 sps:$4 sm:$0xff]  }
 0x16f   :  { %1680 = vmatprep.subr.bf16.mxu0 %v5472_v28  ;;  %1844 = vmatprep.subr.bf16.mxu1 %v5475_v29  ;;  %v5562_v28 = vld [vmem:[#allocation10 + $0x680] ss:$16 sps:$4 sm:$0xff]   ;;  %v5565_v29 = vld [vmem:[#allocation10 + $0x688] ss:$16 sps:$4 sm:$0xff]  }
 0x172   :  { %1681 = vmatpush1.bf16.msra.mxu0 %v5470_v30  ;;  %1845 = vmatpush1.bf16.msra.mxu1 %v5473_v31  ;;  %v5570_v30 = vld [vmem:[#allocation10 + $0x6a4] ss:$16 sps:$4 sm:$0xff]   ;;  %v5573_v31 = vld [vmem:[#allocation10 + $0x6ac] ss:$16 sps:$4 sm:$0xff]  }
 0x173   :  { %1682 = vmatprep.subr.bf16.mxu0 %v5478_v32  ;;  %1846 = vmatprep.subr.bf16.mxu1 %v5481_v33  ;;  %v5568_v32 = vld [vmem:[#allocation10 + $0x6a0] ss:$16 sps:$4 sm:$0xff]   ;;  %v5571_v33 = vld [vmem:[#allocation10 + $0x6a8] ss:$16 sps:$4 sm:$0xff]  }
 0x176   :  { %1683 = vmatpush1.bf16.msra.mxu0 %v5476_v34  ;;  %1847 = vmatpush1.bf16.msra.mxu1 %v5479_v35  ;;  %v5576_v34 = vld [vmem:[#allocation10 + $0x6c4] ss:$16 sps:$4 sm:$0xff]   ;;  %v5579_v35 = vld [vmem:[#allocation10 + $0x6cc] ss:$16 sps:$4 sm:$0xff]  }
 0x177   :  { %1684 = vmatprep.subr.bf16.mxu0 %v5484_v36  ;;  %1848 = vmatprep.subr.bf16.mxu1 %v5487_v37  ;;  %v5574_v36 = vld [vmem:[#allocation10 + $0x6c0] ss:$16 sps:$4 sm:$0xff]   ;;  %v5577_v37 = vld [vmem:[#allocation10 + $0x6c8] ss:$16 sps:$4 sm:$0xff]  }
 0x17a   :  { %1685 = vmatpush1.bf16.msra.mxu0 %v5482_v38  ;;  %1849 = vmatpush1.bf16.msra.mxu1 %v5485_v39  ;;  %v5582_v38 = vld [vmem:[#allocation10 + $0x6e4] ss:$16 sps:$4 sm:$0xff]   ;;  %v5585_v39 = vld [vmem:[#allocation10 + $0x6ec] ss:$16 sps:$4 sm:$0xff]  }
 0x17b   :  { %1686 = vmatprep.subr.bf16.mxu0 %v5490_v40  ;;  %1850 = vmatprep.subr.bf16.mxu1 %v5493_v41  ;;  %v5580_v40 = vld [vmem:[#allocation10 + $0x6e0] ss:$16 sps:$4 sm:$0xff]   ;;  %v5583_v41 = vld [vmem:[#allocation10 + $0x6e8] ss:$16 sps:$4 sm:$0xff]  }
 0x17e   :  { %1687 = vmatpush1.bf16.msra.mxu0 %v5488_v42  ;;  %1851 = vmatpush1.bf16.msra.mxu1 %v5491_v43  ;;  %v5589_v42 = vld [vmem:[#allocation13 + $0x4] ss:$8 sps:$4 sm:$0xff]   ;;  %v5586_v43 = vld [vmem:[#allocation2 + $0x18] ss:$0 sps:$4 sm:$0xff]  }
 0x17f   :  { %1688 = vmatprep.subr.bf16.mxu0 %v5496_v44  ;;  %1852 = vmatprep.subr.bf16.mxu1 %v5499_v45  ;;  %v5587_v44 = vld [vmem:[#allocation13] ss:$8 sps:$4 sm:$0xff]   ;;  %v5592_v45 = vld [vmem:[#allocation13 + $0x14] ss:$8 sps:$4 sm:$0xff]  }
 0x182   :  { %1689 = vmatpush1.bf16.msra.mxu0 %v5494_v46  ;;  %1853 = vmatpush1.bf16.msra.mxu1 %v5497_v47  ;;  %v5590_v46 = vld [vmem:[#allocation13 + $0x10] ss:$8 sps:$4 sm:$0xff]   ;;  %v5595_v47 = vld [vmem:[#allocation13 + $0x24] ss:$8 sps:$4 sm:$0xff]  }
 0x183   :  { %1690 = vmatprep.subr.bf16.mxu0 %v5502_v48  ;;  %1854 = vmatprep.subr.bf16.mxu1 %v5505_v49  ;;  %v5593_v48 = vld [vmem:[#allocation13 + $0x20] ss:$8 sps:$4 sm:$0xff]   ;;  %v5598_v49 = vld [vmem:[#allocation13 + $0x34] ss:$8 sps:$4 sm:$0xff]  }
 0x186   :  { %1691 = vmatpush1.bf16.msra.mxu0 %v5500_v50  ;;  %1855 = vmatpush1.bf16.msra.mxu1 %v5503_v51  ;;  %v5596_v50 = vld [vmem:[#allocation13 + $0x30] ss:$8 sps:$4 sm:$0xff]   ;;  %v5601_v51 = vld [vmem:[#allocation13 + $0x44] ss:$8 sps:$4 sm:$0xff]  }
 0x187   :  { %1692 = vmatprep.subr.bf16.mxu0 %v5508_v52  ;;  %1856 = vmatprep.subr.bf16.mxu1 %v5511_v53  ;;  %v5599_v52 = vld [vmem:[#allocation13 + $0x40] ss:$8 sps:$4 sm:$0xff]   ;;  %v5604_v53 = vld [vmem:[#allocation13 + $0x54] ss:$8 sps:$4 sm:$0xff]  }
 0x18a   :  { %1693 = vmatpush1.bf16.msra.mxu0 %v5506_v54  ;;  %1857 = vmatpush1.bf16.msra.mxu1 %v5509_v55  ;;  %v5602_v54 = vld [vmem:[#allocation13 + $0x50] ss:$8 sps:$4 sm:$0xff]   ;;  %v5607_v55 = vld [vmem:[#allocation13 + $0x64] ss:$8 sps:$4 sm:$0xff]  }
 0x18b   :  { %1694 = vmatprep.subr.bf16.mxu0 %v5514_v56  ;;  %1858 = vmatprep.subr.bf16.mxu1 %v5517_v57  ;;  %v5605_v56 = vld [vmem:[#allocation13 + $0x60] ss:$8 sps:$4 sm:$0xff]   ;;  %v5610_v57 = vld [vmem:[#allocation13 + $0x74] ss:$8 sps:$4 sm:$0xff]  }
 0x18e   :  { %1695 = vmatpush1.bf16.msra.mxu0 %v5512_v58  ;;  %1859 = vmatpush1.bf16.msra.mxu1 %v5515_v59  ;;  %v5608_v58 = vld [vmem:[#allocation13 + $0x70] ss:$8 sps:$4 sm:$0xff]   ;;  %v5613_v59 = vld [vmem:[#allocation13 + $0x84] ss:$8 sps:$4 sm:$0xff]  }
 0x18f   :  { %1696 = vmatprep.subr.bf16.mxu0 %v5520_v60  ;;  %1860 = vmatprep.subr.bf16.mxu1 %v5523_v61  ;;  %v5611_v60 = vld [vmem:[#allocation13 + $0x80] ss:$8 sps:$4 sm:$0xff]   ;;  %v5616_v61 = vld [vmem:[#allocation13 + $0x94] ss:$8 sps:$4 sm:$0xff]  }
 0x192   :  { %1697 = vmatpush1.bf16.msra.mxu0 %v5518_v62  ;;  %1861 = vmatpush1.bf16.msra.mxu1 %v5521_v63  ;;  %v5614_v62 = vld [vmem:[#allocation13 + $0x90] ss:$8 sps:$4 sm:$0xff]   ;;  %v5619_v63 = vld [vmem:[#allocation13 + $0xa4] ss:$8 sps:$4 sm:$0xff]  }
 0x193   :  { %1698 = vmatprep.subr.bf16.mxu0 %v5526_v0  ;;  %1862 = vmatprep.subr.bf16.mxu1 %v5529_v1  ;;  %v5617_v0 = vld [vmem:[#allocation13 + $0xa0] ss:$8 sps:$4 sm:$0xff]   ;;  %v5622_v1 = vld [vmem:[#allocation13 + $0xb4] ss:$8 sps:$4 sm:$0xff]  }
 0x196   :  { %1699 = vmatpush1.bf16.msra.mxu0 %v5524_v2  ;;  %1863 = vmatpush1.bf16.msra.mxu1 %v5527_v3  ;;  %v5620_v2 = vld [vmem:[#allocation13 + $0xb0] ss:$8 sps:$4 sm:$0xff]   ;;  %v5625_v3 = vld [vmem:[#allocation13 + $0xc4] ss:$8 sps:$4 sm:$0xff]  }
 0x197   :  { %1700 = vmatprep.subr.bf16.mxu0 %v5532_v4  ;;  %1864 = vmatprep.subr.bf16.mxu1 %v5535_v5  ;;  %v5623_v4 = vld [vmem:[#allocation13 + $0xc0] ss:$8 sps:$4 sm:$0xff]   ;;  %v5628_v5 = vld [vmem:[#allocation13 + $0xd4] ss:$8 sps:$4 sm:$0xff]  }
 0x19a   :  { %1701 = vmatpush1.bf16.msra.mxu0 %v5530_v6  ;;  %1865 = vmatpush1.bf16.msra.mxu1 %v5533_v7  ;;  %v5626_v6 = vld [vmem:[#allocation13 + $0xd0] ss:$8 sps:$4 sm:$0xff]   ;;  %v5631_v7 = vld [vmem:[#allocation13 + $0xe4] ss:$8 sps:$4 sm:$0xff]  }
 0x19b   :  { %1711 = vmatprep.subr.bf16.mxu0 %v5540_v8  ;;  %1875 = vmatprep.subr.bf16.mxu1 %v5543_v9  ;;  %v5629_v8 = vld [vmem:[#allocation13 + $0xe0] ss:$8 sps:$4 sm:$0xff]   ;;  %v5634_v9 = vld [vmem:[#allocation13 + $0xf4] ss:$8 sps:$4 sm:$0xff]  }
 0x19d   :  { %1703 = vmatmul.mubr.bf16.vlgmr.msra.gmra.mrb[0].mxu0 %v4571_v13  ;;  %1867 = vmatmul.mubr.bf16.vlgmr.msra.gmra.mrb[0].mxu1 %v4571_v13  ;;  %v5683_v13 = vld [vmem:[#allocation16] ss:$16 sps:$4 sm:$0xff]  }
 0x19e   :  { %1712 = vmatpush1.bf16.msra.mxu0 %v5538_v10  ;;  %1876 = vmatpush1.bf16.msra.mxu1 %v5541_v12  ;;  %v5632_v10 = vld [vmem:[#allocation13 + $0xf0] ss:$8 sps:$4 sm:$0xff]   ;;  %v5637_v12 = vld [vmem:[#allocation13 + $0x104] ss:$8 sps:$4 sm:$0xff]  }
 0x19f   :  { %1713 = vmatprep.subr.bf16.mxu0 %v5546_v14  ;;  %1877 = vmatprep.subr.bf16.mxu1 %v5549_v15  ;;  %v5685_v14 = vld [vmem:[#allocation16 + $0x4] ss:$16 sps:$4 sm:$0xff]  }
 0x1a0   :  { %1743 = vmatprep.mubr.bf16.mxu0 %v6411_v22  ;;  %1907 = vmatprep.mubr.bf16.mxu1 %v6411_v22  ;;  %v5688_v15 = vld [vmem:[#allocation16 + $0x24] ss:$16 sps:$4 sm:$0xff]  }
 0x1a2   :  { %1714 = vmatpush1.bf16.msra.mxu0 %v5544_v16  ;;  %1878 = vmatpush1.bf16.msra.mxu1 %v5547_v17  ;;  %v5686_v16 = vld [vmem:[#allocation16 + $0x20] ss:$16 sps:$4 sm:$0xff]   ;;  %v423_v17 = vlaneseq }
 0x1a3   :  { %1715 = vmatprep.subr.bf16.mxu0 %v5552_v18  ;;  %1879 = vmatprep.subr.bf16.mxu1 %v5555_v19 }
 0x1a4   :  { %v6656_v18 = vshrl.u32 %v423_v17, 7  ;;  %v5689_v17 = vld [vmem:[#allocation16 + $0x40] ss:$16 sps:$4 sm:$0xff]  }
 0x1a6   :  { %1716 = vmatpush1.bf16.msra.mxu0 %v5550_v20  ;;  %1880 = vmatpush1.bf16.msra.mxu1 %v5553_v21  ;;  %v6659_v19 = vsub.s32 0, %v6656_v18  ;;  %v6661_v20 = vld [vmem:[#allocation11] sm:$0xf]  ;;  %v6664_v21 = vsub.s32 1, %v6656_v18 }
 0x1a7   :  { %1717 = vmatprep.subr.bf16.mxu0 %v5558_v11  ;;  %1881 = vmatprep.subr.bf16.mxu1 %v5561_v23  ;;  %v6667_v11 = vsub.s32 3, %v6656_v18 }
 0x1a8   :  { %v426_v23 = vrot.slane %v6661_v20, %v6659_v19 }
 0x1aa   :  { %1718 = vmatpush1.bf16.msra.mxu0 %v5556_v24  ;;  %1882 = vmatpush1.bf16.msra.mxu1 %v5559_v25  ;;  %v430_v24 = vrot.slane %v6661_v20, %v6664_v21  ;;  %v438_v25 = vrot.slane %v6661_v20, %v6667_v11 }
 0x1ab   :  { %1719 = vmatprep.subr.bf16.mxu0 %v5564_v26  ;;  %1883 = vmatprep.subr.bf16.mxu1 %v5567_v27 }
 0x1ae   :  { %1720 = vmatpush1.bf16.msra.mxu0 %v5562_v28  ;;  %1884 = vmatpush1.bf16.msra.mxu1 %v5565_v29 }
 0x1af   :  { %1721 = vmatprep.subr.bf16.mxu0 %v5570_v30  ;;  %1885 = vmatprep.subr.bf16.mxu1 %v5573_v31 }
 0x1b2   :  { %1722 = vmatpush1.bf16.msra.mxu0 %v5568_v32  ;;  %1886 = vmatpush1.bf16.msra.mxu1 %v5571_v33 }
 0x1b3   :  { %1723 = vmatprep.subr.bf16.mxu0 %v5576_v34  ;;  %1887 = vmatprep.subr.bf16.mxu1 %v5579_v35 }
 0x1b6   :  { %1724 = vmatpush1.bf16.msra.mxu0 %v5574_v36  ;;  %1888 = vmatpush1.bf16.msra.mxu1 %v5577_v37 }
 0x1b7   :  { %1725 = vmatprep.subr.bf16.mxu0 %v5582_v38  ;;  %1889 = vmatprep.subr.bf16.mxu1 %v5585_v39 }
 0x1ba   :  { %1726 = vmatpush1.bf16.msra.mxu0 %v5580_v40  ;;  %1890 = vmatpush1.bf16.msra.mxu1 %v5583_v41  ;;  %v5635_v41 = vld [vmem:[#allocation13 + $0x100] ss:$8 sps:$4 sm:$0xff]  }
 0x1bb   :  { %2320 = vmatprep.subr.bf16.mxu0 %v5589_v42  ;;  %2631 = vmatprep.subr.bf16.mxu1 %v5685_v14 }
 0x1bd   :  { %1744 = vmatmul.mubr.bf16.vlgmr.msra.gmra.mrb[0].mxu0 %v5586_v43  ;;  %1908 = vmatmul.mubr.bf16.vlgmr.msra.gmra.mrb[0].mxu1 %v5586_v43  ;;  %v5640_v43 = vld [vmem:[#allocation13 + $0x114] ss:$8 sps:$4 sm:$0xff]  }
 0x1be   :  { %2321 = vmatpush1.bf16.msra.mxu0 %v5587_v44  ;;  %2663 = vmatprep.mubr.bf16.mxu1 %v6411_v22 }
 0x1bf   :  { %2322 = vmatprep.subr.bf16.mxu0 %v5592_v45  ;;  %2632 = vmatpush1.bf16.msra.mxu1 %v5683_v13  ;;  %v5638_v45 = vld [vmem:[#allocation13 + $0x110] ss:$8 sps:$4 sm:$0xff]  }
 0x1c0   :  { %2633 = vmatprep.subr.bf16.mxu1 %v5688_v15  ;;  %v5680_v13 = vld [vmem:[#allocation13 + $0x1f0] ss:$8 sps:$4 sm:$0xff]  }
 0x1c2   :  { %2323 = vmatpush1.bf16.msra.mxu0 %v5590_v46  ;;  %v5643_v46 = vld [vmem:[#allocation13 + $0x124] ss:$8 sps:$4 sm:$0xff]  }
 0x1c3   :  { %2324 = vmatprep.subr.bf16.mxu0 %v5595_v47  ;;  %2634 = vmatpush1.bf16.msra.mxu1 %v5686_v16  ;;  %v5641_v47 = vld [vmem:[#allocation13 + $0x120] ss:$8 sps:$4 sm:$0xff]  }
 0x1c4   :  { %v5691_v16 = vld [vmem:[#allocation16 + $0x44] ss:$16 sps:$4 sm:$0xff]  }
 0x1c5   :  { %2635 = vmatprep.subr.bf16.mxu1 %v5691_v16  ;;  %v5712_v16 = vld [vmem:[#allocation16 + $0x2c] ss:$16 sps:$4 sm:$0xff]  }
 0x1c6   :  { %2325 = vmatpush1.bf16.msra.mxu0 %v5593_v48  ;;  %v5646_v48 = vld [vmem:[#allocation13 + $0x134] ss:$8 sps:$4 sm:$0xff]  }
 0x1c7   :  { %2326 = vmatprep.subr.bf16.mxu0 %v5598_v49  ;;  %v5644_v49 = vld [vmem:[#allocation13 + $0x130] ss:$8 sps:$4 sm:$0xff]   ;;  %2636 = vmatpush1.bf16.msra.mxu1 %v5689_v17 }
 0x1c8   :  { %v5710_v17 = vld [vmem:[#allocation16 + $0x28] ss:$16 sps:$4 sm:$0xff]  }
 0x1ca   :  { %2327 = vmatpush1.bf16.msra.mxu0 %v5596_v50  ;;  %v5649_v50 = vld [vmem:[#allocation13 + $0x144] ss:$8 sps:$4 sm:$0xff]  }
 0x1cb   :  { %2328 = vmatprep.subr.bf16.mxu0 %v5601_v51  ;;  %v5647_v51 = vld [vmem:[#allocation13 + $0x140] ss:$8 sps:$4 sm:$0xff]  }
 0x1ce   :  { %2329 = vmatpush1.bf16.msra.mxu0 %v5599_v52  ;;  %v5652_v52 = vld [vmem:[#allocation13 + $0x154] ss:$8 sps:$4 sm:$0xff]  }
 0x1cf   :  { %2330 = vmatprep.subr.bf16.mxu0 %v5604_v53  ;;  %v5650_v53 = vld [vmem:[#allocation13 + $0x150] ss:$8 sps:$4 sm:$0xff]  }
 0x1d2   :  { %2331 = vmatpush1.bf16.msra.mxu0 %v5602_v54  ;;  %v5655_v54 = vld [vmem:[#allocation13 + $0x164] ss:$8 sps:$4 sm:$0xff]  }
 0x1d3   :  { %2332 = vmatprep.subr.bf16.mxu0 %v5607_v55  ;;  %v5653_v55 = vld [vmem:[#allocation13 + $0x160] ss:$8 sps:$4 sm:$0xff]  }
 0x1d6   :  { %2333 = vmatpush1.bf16.msra.mxu0 %v5605_v56  ;;  %v5658_v56 = vld [vmem:[#allocation13 + $0x174] ss:$8 sps:$4 sm:$0xff]  }
 0x1d7   :  { %2334 = vmatprep.subr.bf16.mxu0 %v5610_v57  ;;  %v5656_v57 = vld [vmem:[#allocation13 + $0x170] ss:$8 sps:$4 sm:$0xff]  }
 0x1da   :  { %2335 = vmatpush1.bf16.msra.mxu0 %v5608_v58  ;;  %v5661_v58 = vld [vmem:[#allocation13 + $0x184] ss:$8 sps:$4 sm:$0xff]  }
 0x1db   :  { %2336 = vmatprep.subr.bf16.mxu0 %v5613_v59  ;;  %v5659_v59 = vld [vmem:[#allocation13 + $0x180] ss:$8 sps:$4 sm:$0xff]  }
 0x1de   :  { %2337 = vmatpush1.bf16.msra.mxu0 %v5611_v60  ;;  %v5664_v60 = vld [vmem:[#allocation13 + $0x194] ss:$8 sps:$4 sm:$0xff]  }
 0x1df   :  { %2338 = vmatprep.subr.bf16.mxu0 %v5616_v61  ;;  %v5662_v61 = vld [vmem:[#allocation13 + $0x190] ss:$8 sps:$4 sm:$0xff]  }
 0x1e2   :  { %2339 = vmatpush1.bf16.msra.mxu0 %v5614_v62  ;;  %v5667_v62 = vld [vmem:[#allocation13 + $0x1a4] ss:$8 sps:$4 sm:$0xff]  }
 0x1e3   :  { %2340 = vmatprep.subr.bf16.mxu0 %v5619_v63  ;;  %v5665_v63 = vld [vmem:[#allocation13 + $0x1a0] ss:$8 sps:$4 sm:$0xff]  }
 0x1e6   :  { %2341 = vmatpush1.bf16.msra.mxu0 %v5617_v0  ;;  %v5670_v0 = vld [vmem:[#allocation13 + $0x1b4] ss:$8 sps:$4 sm:$0xff]  }
 0x1e7   :  { %2342 = vmatprep.subr.bf16.mxu0 %v5622_v1  ;;  %v5668_v1 = vld [vmem:[#allocation13 + $0x1b0] ss:$8 sps:$4 sm:$0xff]  }
 0x1ea   :  { %2343 = vmatpush1.bf16.msra.mxu0 %v5620_v2  ;;  %v5673_v2 = vld [vmem:[#allocation13 + $0x1c4] ss:$8 sps:$4 sm:$0xff]  }
 0x1eb   :  { %2344 = vmatprep.subr.bf16.mxu0 %v5625_v3  ;;  %v5671_v3 = vld [vmem:[#allocation13 + $0x1c0] ss:$8 sps:$4 sm:$0xff]  }
 0x1ee   :  { %2345 = vmatpush1.bf16.msra.mxu0 %v5623_v4  ;;  %v6678_v4 = vsub.s32 2, %v6656_v18 }
 0x1ef   :  { %2346 = vmatprep.subr.bf16.mxu0 %v5628_v5  ;;  %v5676_v5 = vld [vmem:[#allocation13 + $0x1d4] ss:$8 sps:$4 sm:$0xff]  }
 0x1f2   :  { %2347 = vmatpush1.bf16.msra.mxu0 %v5626_v6  ;;  %v5674_v6 = vld [vmem:[#allocation13 + $0x1d0] ss:$8 sps:$4 sm:$0xff]  }
 0x1f3   :  { %2348 = vmatprep.subr.bf16.mxu0 %v5631_v7  ;;  %v434_v7 = vrot.slane %v6661_v20, %v6678_v4  ;;  %v5694_v20 = vld [vmem:[#allocation16 + $0x64] ss:$16 sps:$4 sm:$0xff]  }
 0x1f4   :  { %2637 = vmatprep.subr.bf16.mxu1 %v5694_v20  ;;  %v5715_v20 = vld [vmem:[#allocation16 + $0x4c] ss:$16 sps:$4 sm:$0xff]  }
 0x1f6   :  { %2349 = vmatpush1.bf16.msra.mxu0 %v5629_v8  ;;  %v5679_v8 = vld [vmem:[#allocation13 + $0x1e4] ss:$8 sps:$4 sm:$0xff]  }
 0x1f7   :  { %2350 = vmatprep.subr.bf16.mxu0 %v5634_v9  ;;  %v5677_v9 = vld [vmem:[#allocation13 + $0x1e0] ss:$8 sps:$4 sm:$0xff]  }
 0x1fa   :  { %2351 = vmatpush1.bf16.msra.mxu0 %v5632_v10 }
 0x1fb   :  { %2361 = vmatprep.subr.bf16.mxu0 %v5637_v12  ;;  %v5682_v12 = vld [vmem:[#allocation13 + $0x1f4] ss:$8 sps:$4 sm:$0xff]  }
 0x290   :  { %v1745_v26 = vpop.f32.mrb[0].mxu0  ;;  %v6675_v27 = vpop.f32.mrb[0].mxu1 }
 0x291   :  { %v5171_v28 = vadd.f32 %v1745_v26, %v426_v23  ;;  %v1747_v29 = vpop.f32.mrb[1].mxu0  ;;  %v1911_v30 = vpop.f32.mrb[1].mxu1  ;;  %v5173_v10 = vadd.f32 %v6675_v27, %v434_v7  ;;  %v5692_v23 = vld [vmem:[#allocation16 + $0x60] ss:$16 sps:$4 sm:$0xff]   ;;  %v5700_v26 = vld [vmem:[#allocation16 + $0xa4] ss:$16 sps:$4 sm:$0xff]  }
 0x292   :  { %v5172_v31 = vadd.f32 %v1747_v29, %v430_v24  ;;  %v5174_v32 = vadd.f32 %v1911_v30, %v438_v25  ;;  %v1749_v33 = vpop.f32.mrb[2].mxu0  ;;  %v1913_v34 = vpop.f32.mrb[2].mxu1  ;;  %2638 = vmatpush1.bf16.msra.mxu1 %v5692_v23  ;;  %v5697_v24 = vld [vmem:[#allocation16 + $0x84] ss:$16 sps:$4 sm:$0xff]   ;;  %v5695_v25 = vld [vmem:[#allocation16 + $0x80] ss:$16 sps:$4 sm:$0xff]  }
 0x293   :  { %v1916_v35 = vmax.f32 %v5171_v28, 0.0  ;;  %v1750_v36 = vpop.f32.mrb[3].mxu0  ;;  %v1914_v37 = vpop.f32.mrb[3].mxu1  ;;  %v1918_v14 = vmax.f32 %v5173_v10, 0.0  ;;  %2639 = vmatprep.subr.bf16.mxu1 %v5697_v24  ;;  %v5698_v27 = vld [vmem:[#allocation16 + $0xa0] ss:$16 sps:$4 sm:$0xff]  }
 0x294   :  { %v1917_v38 = vmax.f32 %v5172_v31, 0.0  ;;  %v1919_v39 = vmax.f32 %v5174_v32, 0.0  ;;  %v5703_v28 = vld [vmem:[#allocation16 + $0xc4] ss:$16 sps:$4 sm:$0xff]   ;;  %v5701_v29 = vld [vmem:[#allocation16 + $0xc0] ss:$16 sps:$4 sm:$0xff]  }
 0x295   :  { %v1920_v42 = vpack.c.bf16 %v1916_v35, %v1916_v35  ;;  %v1922_v15 = vpack.c.bf16 %v1918_v14, %v1918_v14  ;;  %v5706_v30 = vld [vmem:[#allocation16 + $0xe4] ss:$16 sps:$4 sm:$0xff]   ;;  %v5704_v31 = vld [vmem:[#allocation16 + $0xe0] ss:$16 sps:$4 sm:$0xff]   ;;  %v5709_v32 = vld [vmem:[#allocation16 + $0xc] ss:$16 sps:$4 sm:$0xff]  }
 0x296   :  { %v1921_v40 = vpack.c.bf16 %v1917_v38, %v1917_v38  ;;  %v1923_v44 = vpack.c.bf16 %v1919_v39, %v1919_v39  ;;  %2640 = vmatpush1.bf16.msra.mxu1 %v5695_v25  ;;  %v5734_v33 = vld [vmem:[#allocation19 + $0x8] ss:$28 sps:$4 sm:$0xff]   ;;  %v5740_v36 = vld [vmem:[#allocation19 + $0x40] ss:$28 sps:$4 sm:$0xff]   ;;  %v5746_v38 = vld [vmem:[#allocation19 + $0x78] ss:$28 sps:$4 sm:$0xff]  }
 0x297   :  { %2641 = vmatprep.subr.bf16.mxu1 %v5700_v26  ;;  %v5736_v34 = vld [vmem:[#allocation19 + $0xc] ss:$28 sps:$4 sm:$0xff]   ;;  %v5742_v35 = vld [vmem:[#allocation19 + $0x44] ss:$28 sps:$4 sm:$0xff]   ;;  %v5748_v37 = vld [vmem:[#allocation19 + $0x7c] ss:$28 sps:$4 sm:$0xff]  }
 0x298   :  { %2352 = vmatprep.mubr.bf16.mxu0 %v1921_v40  ;;  %v5754_v39 = vld [vmem:[#allocation19 + $0xb4] ss:$28 sps:$4 sm:$0xff]   ;;  %v5718_v24 = vld [vmem:[#allocation16 + $0x6c] ss:$16 sps:$4 sm:$0xff]  }
 0x299   :  { %2353 = vmatmul.mubr.bf16.vlgmr.msra.gmra.mrb[4].mxu0 %v1920_v42  ;;  %v5752_v40 = vld [vmem:[#allocation19 + $0xb0] ss:$28 sps:$4 sm:$0xff]   ;;  %v5758_v42 = vld [vmem:[#allocation19 + $0xe8] ss:$28 sps:$4 sm:$0xff]  }
 0x29a   :  { %2362 = vmatpush1.bf16.msra.mxu0 %v5635_v41  ;;  %2393 = vmatprep.mubr.bf16.mxu0 %v1923_v44  ;;  %v5760_v41 = vld [vmem:[#allocation19 + $0xec] ss:$28 sps:$4 sm:$0xff]   ;;  %v5764_v44 = vld [vmem:[#allocation19 + $0x120] ss:$28 sps:$4 sm:$0xff]   ;;  %v5707_v14 = vld [vmem:[#allocation16 + $0x8] ss:$16 sps:$4 sm:$0xff]  }
 0x29b   :  { %2363 = vmatprep.subr.bf16.mxu0 %v5640_v43  ;;  %2642 = vmatpush1.bf16.msra.mxu1 %v5698_v27  ;;  %v5766_v43 = vld [vmem:[#allocation19 + $0x124] ss:$28 sps:$4 sm:$0xff]   ;;  %v5721_v26 = vld [vmem:[#allocation16 + $0x8c] ss:$16 sps:$4 sm:$0xff]  }
 0x29c   :  { %2643 = vmatprep.subr.bf16.mxu1 %v5703_v28  ;;  %v5713_v23 = vld [vmem:[#allocation16 + $0x48] ss:$16 sps:$4 sm:$0xff]   ;;  %v5724_v28 = vld [vmem:[#allocation16 + $0xac] ss:$16 sps:$4 sm:$0xff]  }
 0x29d   :  { %v5716_v25 = vld [vmem:[#allocation16 + $0x68] ss:$16 sps:$4 sm:$0xff]  }
 0x29e   :  { %2364 = vmatpush1.bf16.msra.mxu0 %v5638_v45  ;;  %v5772_v45 = vld [vmem:[#allocation19 + $0x15c] ss:$28 sps:$4 sm:$0xff]   ;;  %v5719_v27 = vld [vmem:[#allocation16 + $0x88] ss:$16 sps:$4 sm:$0xff]  }
 0x29f   :  { %2365 = vmatprep.subr.bf16.mxu0 %v5643_v46  ;;  %2644 = vmatpush1.bf16.msra.mxu1 %v5701_v29  ;;  %v5770_v46 = vld [vmem:[#allocation19 + $0x158] ss:$28 sps:$4 sm:$0xff]  }
 0x2a0   :  { %2645 = vmatprep.subr.bf16.mxu1 %v5706_v30  ;;  %v5722_v29 = vld [vmem:[#allocation16 + $0xa8] ss:$16 sps:$4 sm:$0xff]   ;;  %v5727_v30 = vld [vmem:[#allocation16 + $0xcc] ss:$16 sps:$4 sm:$0xff]  }
 0x2a2   :  { %2366 = vmatpush1.bf16.msra.mxu0 %v5641_v47  ;;  %v5778_v47 = vld [vmem:[#allocation19 + $0x194] ss:$28 sps:$4 sm:$0xff]  }
 0x2a3   :  { %2367 = vmatprep.subr.bf16.mxu0 %v5646_v48  ;;  %2646 = vmatpush1.bf16.msra.mxu1 %v5704_v31  ;;  %v5776_v48 = vld [vmem:[#allocation19 + $0x190] ss:$28 sps:$4 sm:$0xff]   ;;  %v5730_v31 = vld [vmem:[#allocation16 + $0xec] ss:$16 sps:$4 sm:$0xff]  }
 0x2a4   :  { %2672 = vmatprep.subr.bf16.mxu1 %v5709_v32  ;;  %v5728_v32 = vld [vmem:[#allocation16 + $0xe8] ss:$16 sps:$4 sm:$0xff]  }
 0x2a6   :  { %2368 = vmatpush1.bf16.msra.mxu0 %v5644_v49  ;;  %v5784_v49 = vld [vmem:[#allocation19 + $0x1cc] ss:$28 sps:$4 sm:$0xff]  }
 0x2a7   :  { %2369 = vmatprep.subr.bf16.mxu0 %v5649_v50  ;;  %v5782_v50 = vld [vmem:[#allocation19 + $0x1c8] ss:$28 sps:$4 sm:$0xff]  }
 0x2aa   :  { %2370 = vmatpush1.bf16.msra.mxu0 %v5647_v51  ;;  %v5790_v51 = vld [vmem:[#allocation19 + $0x204] ss:$28 sps:$4 sm:$0xff]  }
 0x2ab   :  { %2371 = vmatprep.subr.bf16.mxu0 %v5652_v52  ;;  %v5788_v52 = vld [vmem:[#allocation19 + $0x200] ss:$28 sps:$4 sm:$0xff]  }
 0x2ae   :  { %2372 = vmatpush1.bf16.msra.mxu0 %v5650_v53  ;;  %v5796_v53 = vld [vmem:[#allocation19 + $0x23c] ss:$28 sps:$4 sm:$0xff]  }
 0x2af   :  { %2373 = vmatprep.subr.bf16.mxu0 %v5655_v54  ;;  %v5794_v54 = vld [vmem:[#allocation19 + $0x238] ss:$28 sps:$4 sm:$0xff]  }
 0x2b2   :  { %2374 = vmatpush1.bf16.msra.mxu0 %v5653_v55  ;;  %v5802_v55 = vld [vmem:[#allocation19 + $0x274] ss:$28 sps:$4 sm:$0xff]  }
 0x2b3   :  { %2375 = vmatprep.subr.bf16.mxu0 %v5658_v56  ;;  %v5800_v56 = vld [vmem:[#allocation19 + $0x270] ss:$28 sps:$4 sm:$0xff]  }
 0x2b6   :  { %2376 = vmatpush1.bf16.msra.mxu0 %v5656_v57  ;;  %v5808_v57 = vld [vmem:[#allocation19 + $0x2ac] ss:$28 sps:$4 sm:$0xff]  }
 0x2b7   :  { %2377 = vmatprep.subr.bf16.mxu0 %v5661_v58  ;;  %v5806_v58 = vld [vmem:[#allocation19 + $0x2a8] ss:$28 sps:$4 sm:$0xff]  }
 0x2ba   :  { %2378 = vmatpush1.bf16.msra.mxu0 %v5659_v59  ;;  %v5814_v59 = vld [vmem:[#allocation19 + $0x2e4] ss:$28 sps:$4 sm:$0xff]  }
 0x2bb   :  { %2379 = vmatprep.subr.bf16.mxu0 %v5664_v60  ;;  %v5812_v60 = vld [vmem:[#allocation19 + $0x2e0] ss:$28 sps:$4 sm:$0xff]  }
 0x2be   :  { %2380 = vmatpush1.bf16.msra.mxu0 %v5662_v61  ;;  %v1988_v61 = vld [vmem:[#allocation14] sm:$0x3] }
 0x2bf   :  { %2381 = vmatprep.subr.bf16.mxu0 %v5667_v62  ;;  %v1993_v62 = vrot.slane %v1988_v61, %v6659_v19 }
 0x2c2   :  { %2382 = vmatpush1.bf16.msra.mxu0 %v5665_v63  ;;  %v1997_v63 = vrot.slane %v1988_v61, %v6664_v21  ;;  %v5817_v61 = vld [vmem:[#allocation19 + $0x314] ss:$28 sps:$4 sm:$0xff]  }
 0x2c3   :  { %2383 = vmatprep.subr.bf16.mxu0 %v5670_v0 }
 0x2c6   :  { %2384 = vmatpush1.bf16.msra.mxu0 %v5668_v1 }
 0x2c7   :  { %2385 = vmatprep.subr.bf16.mxu0 %v5673_v2 }
 0x2ca   :  { %2386 = vmatpush1.bf16.msra.mxu0 %v5671_v3 }
 0x2cb   :  { %2387 = vmatprep.subr.bf16.mxu0 %v5676_v5 }
 0x2ce   :  { %2388 = vmatpush1.bf16.msra.mxu0 %v5674_v6 }
 0x2cf   :  { %2389 = vmatprep.subr.bf16.mxu0 %v5679_v8 }
 0x2d2   :  { %2390 = vmatpush1.bf16.msra.mxu0 %v5677_v9  ;;  %v4862_v9 = vld [vmem:[#allocation5] ss:$0 sm:$0xff] }
 0x2d3   :  { %2391 = vmatprep.subr.bf16.mxu0 %v5682_v12 }
 0x2d6   :  { %2392 = vmatpush1.bf16.msra.mxu0 %v5680_v13 }
 0x2d7   :  { %4248 = vmatprep.subr.bf16.mxu0 %v5736_v34  ;;  %v5731_v34 = vld [vmem:[#allocation19] ss:$28 sps:$4 sm:$0xff]  }
 0x2d9   :  { %2394 = vmatmul.mubr.bf16.vlgmr.msra.gmra.mrb[4].mxu0 %v1922_v15 }
 0x2da   :  { %4249 = vmatpush1.bf16.msra.mxu0 %v5734_v33  ;;  %v5733_v33 = vld [vmem:[#allocation19 + $0x4] ss:$28 sps:$4 sm:$0xff]  }
 0x2db   :  { %4250 = vmatprep.subr.bf16.mxu0 %v5742_v35  ;;  %v5739_v35 = vld [vmem:[#allocation19 + $0x3c] ss:$28 sps:$4 sm:$0xff]  }
 0x2de   :  { %4251 = vmatpush1.bf16.msra.mxu0 %v5740_v36  ;;  %v5737_v36 = vld [vmem:[#allocation19 + $0x38] ss:$28 sps:$4 sm:$0xff]  }
 0x2df   :  { %4252 = vmatprep.subr.bf16.mxu0 %v5748_v37  ;;  %v5745_v37 = vld [vmem:[#allocation19 + $0x74] ss:$28 sps:$4 sm:$0xff]  }
 0x2e2   :  { %4253 = vmatpush1.bf16.msra.mxu0 %v5746_v38  ;;  %v5743_v38 = vld [vmem:[#allocation19 + $0x70] ss:$28 sps:$4 sm:$0xff]  }
 0x2e3   :  { %4254 = vmatprep.subr.bf16.mxu0 %v5754_v39  ;;  %v5751_v39 = vld [vmem:[#allocation19 + $0xac] ss:$28 sps:$4 sm:$0xff]  }
 0x2e6   :  { %4255 = vmatpush1.bf16.msra.mxu0 %v5752_v40  ;;  %v5749_v40 = vld [vmem:[#allocation19 + $0xa8] ss:$28 sps:$4 sm:$0xff]  }
 0x2e7   :  { %4256 = vmatprep.subr.bf16.mxu0 %v5760_v41  ;;  %v5757_v41 = vld [vmem:[#allocation19 + $0xe4] ss:$28 sps:$4 sm:$0xff]  }
 0x2ea   :  { %4257 = vmatpush1.bf16.msra.mxu0 %v5758_v42  ;;  %v5755_v42 = vld [vmem:[#allocation19 + $0xe0] ss:$28 sps:$4 sm:$0xff]  }
 0x2eb   :  { %4258 = vmatprep.subr.bf16.mxu0 %v5766_v43  ;;  %v5763_v43 = vld [vmem:[#allocation19 + $0x11c] ss:$28 sps:$4 sm:$0xff]  }
 0x2ee   :  { %4259 = vmatpush1.bf16.msra.mxu0 %v5764_v44  ;;  %v5761_v44 = vld [vmem:[#allocation19 + $0x118] ss:$28 sps:$4 sm:$0xff]  }
 0x2ef   :  { %4260 = vmatprep.subr.bf16.mxu0 %v5772_v45  ;;  %v5769_v45 = vld [vmem:[#allocation19 + $0x154] ss:$28 sps:$4 sm:$0xff]  }
 0x2f2   :  { %4261 = vmatpush1.bf16.msra.mxu0 %v5770_v46  ;;  %v5767_v46 = vld [vmem:[#allocation19 + $0x150] ss:$28 sps:$4 sm:$0xff]  }
 0x2f3   :  { %4262 = vmatprep.subr.bf16.mxu0 %v5778_v47  ;;  %v5775_v47 = vld [vmem:[#allocation19 + $0x18c] ss:$28 sps:$4 sm:$0xff]  }
 0x2f6   :  { %4263 = vmatpush1.bf16.msra.mxu0 %v5776_v48  ;;  %v5773_v48 = vld [vmem:[#allocation19 + $0x188] ss:$28 sps:$4 sm:$0xff]  }
 0x2f7   :  { %4264 = vmatprep.subr.bf16.mxu0 %v5784_v49  ;;  %v5781_v49 = vld [vmem:[#allocation19 + $0x1c4] ss:$28 sps:$4 sm:$0xff]  }
 0x2fa   :  { %4265 = vmatpush1.bf16.msra.mxu0 %v5782_v50  ;;  %v5779_v50 = vld [vmem:[#allocation19 + $0x1c0] ss:$28 sps:$4 sm:$0xff]  }
 0x2fb   :  { %4266 = vmatprep.subr.bf16.mxu0 %v5790_v51  ;;  %v5787_v51 = vld [vmem:[#allocation19 + $0x1fc] ss:$28 sps:$4 sm:$0xff]  }
 0x2fe   :  { %4267 = vmatpush1.bf16.msra.mxu0 %v5788_v52  ;;  %v5785_v52 = vld [vmem:[#allocation19 + $0x1f8] ss:$28 sps:$4 sm:$0xff]  }
 0x2ff   :  { %4268 = vmatprep.subr.bf16.mxu0 %v5796_v53  ;;  %v5793_v53 = vld [vmem:[#allocation19 + $0x234] ss:$28 sps:$4 sm:$0xff]  }
 0x302   :  { %4269 = vmatpush1.bf16.msra.mxu0 %v5794_v54  ;;  %v5791_v54 = vld [vmem:[#allocation19 + $0x230] ss:$28 sps:$4 sm:$0xff]  }
 0x303   :  { %4270 = vmatprep.subr.bf16.mxu0 %v5802_v55  ;;  %v5799_v55 = vld [vmem:[#allocation19 + $0x26c] ss:$28 sps:$4 sm:$0xff]  }
 0x306   :  { %4271 = vmatpush1.bf16.msra.mxu0 %v5800_v56  ;;  %v5797_v56 = vld [vmem:[#allocation19 + $0x268] ss:$28 sps:$4 sm:$0xff]  }
 0x307   :  { %4272 = vmatprep.subr.bf16.mxu0 %v5808_v57  ;;  %v5805_v57 = vld [vmem:[#allocation19 + $0x2a4] ss:$28 sps:$4 sm:$0xff]  }
 0x30a   :  { %4273 = vmatpush1.bf16.msra.mxu0 %v5806_v58  ;;  %v5803_v58 = vld [vmem:[#allocation19 + $0x2a0] ss:$28 sps:$4 sm:$0xff]  }
 0x30b   :  { %4274 = vmatprep.subr.bf16.mxu0 %v5814_v59  ;;  %v5811_v59 = vld [vmem:[#allocation19 + $0x2dc] ss:$28 sps:$4 sm:$0xff]  }
 0x30e   :  { %4275 = vmatpush1.bf16.msra.mxu0 %v5812_v60  ;;  %v5809_v60 = vld [vmem:[#allocation19 + $0x2d8] ss:$28 sps:$4 sm:$0xff]  }
 0x3ac   :  { %v2395_v0 = vpop.f32.mrb[4].mxu0 }
 0x3ad   :  { %v5175_v1 = vadd.f32 %v2395_v0, %v1993_v62  ;;  %v2397_v2 = vpop.f32.mrb[5].mxu0  ;;  %v5820_v62 = vld [vmem:[#allocation19 + $0x31c] ss:$28 sps:$4 sm:$0xff]   ;;  %v5815_v0 = vld [vmem:[#allocation19 + $0x310] ss:$28 sps:$4 sm:$0xff]  }
 0x3ae   :  { %v5176_v3 = vadd.f32 %v2397_v2, %v1997_v63  ;;  %v2399_v5 = vpop.f32.mrb[6].mxu0  ;;  %v5818_v63 = vld [vmem:[#allocation19 + $0x318] ss:$28 sps:$4 sm:$0xff]   ;;  %4276 = vmatprep.subr.bf16.mxu0 %v5820_v62  ;;  %v5880_v62 = vld [vmem:[#allocation19 + $0x54c] ss:$28 sps:$4 sm:$0xff]  }
 0x3af   :  { %2402 = vst [vmem:[#allocation22] sm:$0xff] %v5175_v1  ;;  %v2400_v6 = vpop.f32.mrb[7].mxu0  ;;  %4277 = vmatpush1.bf16.msra.mxu0 %v5818_v63  ;;  %v5826_v2 = vld [vmem:[#allocation19 + $0x354] ss:$28 sps:$4 sm:$0xff]   ;;  %v5821_v5 = vld [vmem:[#allocation19 + $0x348] ss:$28 sps:$4 sm:$0xff]  }
 0x3b0   :  { %2403 = vst [vmem:[#allocation22 + $0x8] sm:$0xff] %v5176_v3  ;;  %v2404_v7 = vmul.f32 0.5, %v5176_v3  ;;  %v5824_v3 = vld [vmem:[#allocation19 + $0x350] ss:$28 sps:$4 sm:$0xff]   ;;  %4278 = vmatprep.subr.bf16.mxu0 %v5826_v2  ;;  %v5829_v6 = vld [vmem:[#allocation19 + $0x384] ss:$28 sps:$4 sm:$0xff]  }
 0x3b1   :  { %v5878_v2 = vld [vmem:[#allocation19 + $0x548] ss:$28 sps:$4 sm:$0xff]  }
 0x3b2   :  { %v2405_v8 = vmul.f32 1.442695, %v2404_v7  ;;  %v5832_v7 = vld [vmem:[#allocation19 + $0x38c] ss:$28 sps:$4 sm:$0xff]  }
 0x3b3   :  { %4279 = vmatpush1.bf16.msra.mxu0 %v5824_v3  ;;  %v5883_v3 = vld [vmem:[#allocation19 + $0x57c] ss:$28 sps:$4 sm:$0xff]  }
 0x3b4   :  { %6051 = vpow2.f32 %v2405_v8  ;;  %4289 = vmatprep.subr.bf16.mxu0 %v5832_v7  ;;  %v6686_v8 = vld [vmem:[#allocation17] sm:$0xf] }
 0x3b5   :  { %v5884_v7 = vld [vmem:[#allocation19 + $0x580] ss:$28 sps:$4 sm:$0xff]  }
 0x3be   :  { %v6052_v10 = vpop.eup %6051 }
 0x3bf   :  { %v2414_v12 = vmul.f32 %v6052_v10, %v4862_v9  ;;  %v2454_v9 = vrot.slane %v6686_v8, %v6659_v19  ;;  %v2458_v10 = vrot.slane %v6686_v8, %v6664_v21 }
 0x3c1   :  { %v2415_v13 = vadd.f32 %v5175_v1, %v2414_v12  ;;  %v5823_v1 = vld [vmem:[#allocation19 + $0x34c] ss:$28 sps:$4 sm:$0xff]  }
 0x3c3   :  { %v2416_v15 = vpack.c.bf16 %v2415_v13, %v2415_v13 }
 0x3c5   :  { %2664 = vmatmul.mubr.bf16.vlgmr.msra.gmra.mrb[4].mxu1 %v2416_v15 }
 0x3c6   :  { %2673 = vmatpush1.bf16.msra.mxu1 %v5707_v14  ;;  %2704 = vmatprep.mubr.bf16.mxu1 %v6411_v22  ;;  %v5725_v22 = vld [vmem:[#allocation16 + $0xc8] ss:$16 sps:$4 sm:$0xff]  }
 0x3c7   :  { %2674 = vmatprep.subr.bf16.mxu1 %v5712_v16 }
 0x3ca   :  { %2675 = vmatpush1.bf16.msra.mxu1 %v5710_v17 }
 0x3cb   :  { %2676 = vmatprep.subr.bf16.mxu1 %v5715_v20 }
 0x3ce   :  { %2677 = vmatpush1.bf16.msra.mxu1 %v5713_v23 }
 0x3cf   :  { %2678 = vmatprep.subr.bf16.mxu1 %v5718_v24 }
 0x3d2   :  { %2679 = vmatpush1.bf16.msra.mxu1 %v5716_v25  ;;  %v5827_v25 = vld [vmem:[#allocation19 + $0x380] ss:$28 sps:$4 sm:$0xff]  }
 0x3d3   :  { %2680 = vmatprep.subr.bf16.mxu1 %v5721_v26  ;;  %v5830_v26 = vld [vmem:[#allocation19 + $0x388] ss:$28 sps:$4 sm:$0xff]  }
 0x3d6   :  { %2681 = vmatpush1.bf16.msra.mxu1 %v5719_v27 }
 0x3d7   :  { %2682 = vmatprep.subr.bf16.mxu1 %v5724_v28  ;;  %v5835_v28 = vld [vmem:[#allocation19 + $0x3bc] ss:$28 sps:$4 sm:$0xff]  }
 0x3da   :  { %2683 = vmatpush1.bf16.msra.mxu1 %v5722_v29  ;;  %v5838_v29 = vld [vmem:[#allocation19 + $0x3c4] ss:$28 sps:$4 sm:$0xff]  }
 0x3db   :  { %2684 = vmatprep.subr.bf16.mxu1 %v5727_v30  ;;  %v5833_v30 = vld [vmem:[#allocation19 + $0x3b8] ss:$28 sps:$4 sm:$0xff]  }
 0x3de   :  { %2685 = vmatpush1.bf16.msra.mxu1 %v5725_v22  ;;  %v5836_v22 = vld [vmem:[#allocation19 + $0x3c0] ss:$28 sps:$4 sm:$0xff]  }
 0x3df   :  { %2686 = vmatprep.subr.bf16.mxu1 %v5730_v31  ;;  %v5841_v31 = vld [vmem:[#allocation19 + $0x3f4] ss:$28 sps:$4 sm:$0xff]  }
 0x3e2   :  { %2687 = vmatpush1.bf16.msra.mxu1 %v5728_v32  ;;  %v5844_v32 = vld [vmem:[#allocation19 + $0x3fc] ss:$28 sps:$4 sm:$0xff]  }
 0x3e3   :  { %4166 = vmatprep.subr.bf16.mxu1 %v5733_v33  ;;  %v5839_v33 = vld [vmem:[#allocation19 + $0x3f0] ss:$28 sps:$4 sm:$0xff]  }
 0x3e5   :  { %2705 = vmatmul.mubr.bf16.vlgmr.msra.gmra.mrb[8].mxu1 %v2416_v15 }
 0x3e6   :  { %4167 = vmatpush1.bf16.msra.mxu1 %v5731_v34  ;;  %v5842_v34 = vld [vmem:[#allocation19 + $0x3f8] ss:$28 sps:$4 sm:$0xff]  }
 0x3e7   :  { %4168 = vmatprep.subr.bf16.mxu1 %v5739_v35  ;;  %v5847_v35 = vld [vmem:[#allocation19 + $0x42c] ss:$28 sps:$4 sm:$0xff]  }
 0x3ea   :  { %4169 = vmatpush1.bf16.msra.mxu1 %v5737_v36  ;;  %v5850_v36 = vld [vmem:[#allocation19 + $0x434] ss:$28 sps:$4 sm:$0xff]  }
 0x3eb   :  { %4170 = vmatprep.subr.bf16.mxu1 %v5745_v37  ;;  %v5845_v37 = vld [vmem:[#allocation19 + $0x428] ss:$28 sps:$4 sm:$0xff]  }
 0x3ee   :  { %4171 = vmatpush1.bf16.msra.mxu1 %v5743_v38  ;;  %v5848_v38 = vld [vmem:[#allocation19 + $0x430] ss:$28 sps:$4 sm:$0xff]  }
 0x3ef   :  { %4172 = vmatprep.subr.bf16.mxu1 %v5751_v39  ;;  %v5853_v39 = vld [vmem:[#allocation19 + $0x464] ss:$28 sps:$4 sm:$0xff]  }
 0x3f2   :  { %4173 = vmatpush1.bf16.msra.mxu1 %v5749_v40  ;;  %v5856_v40 = vld [vmem:[#allocation19 + $0x46c] ss:$28 sps:$4 sm:$0xff]  }
 0x3f3   :  { %4174 = vmatprep.subr.bf16.mxu1 %v5757_v41  ;;  %v5851_v41 = vld [vmem:[#allocation19 + $0x460] ss:$28 sps:$4 sm:$0xff]  }
 0x3f6   :  { %4175 = vmatpush1.bf16.msra.mxu1 %v5755_v42  ;;  %v5854_v42 = vld [vmem:[#allocation19 + $0x468] ss:$28 sps:$4 sm:$0xff]  }
 0x3f7   :  { %4176 = vmatprep.subr.bf16.mxu1 %v5763_v43  ;;  %v5859_v43 = vld [vmem:[#allocation19 + $0x49c] ss:$28 sps:$4 sm:$0xff]  }
 0x3fa   :  { %4177 = vmatpush1.bf16.msra.mxu1 %v5761_v44  ;;  %v5862_v44 = vld [vmem:[#allocation19 + $0x4a4] ss:$28 sps:$4 sm:$0xff]  }
 0x3fb   :  { %4178 = vmatprep.subr.bf16.mxu1 %v5769_v45  ;;  %v5857_v45 = vld [vmem:[#allocation19 + $0x498] ss:$28 sps:$4 sm:$0xff]  }
 0x3fe   :  { %4179 = vmatpush1.bf16.msra.mxu1 %v5767_v46  ;;  %v5860_v46 = vld [vmem:[#allocation19 + $0x4a0] ss:$28 sps:$4 sm:$0xff]  }
 0x3ff   :  { %4180 = vmatprep.subr.bf16.mxu1 %v5775_v47  ;;  %v5865_v47 = vld [vmem:[#allocation19 + $0x4d4] ss:$28 sps:$4 sm:$0xff]  }
 0x402   :  { %4181 = vmatpush1.bf16.msra.mxu1 %v5773_v48  ;;  %v5868_v48 = vld [vmem:[#allocation19 + $0x4dc] ss:$28 sps:$4 sm:$0xff]  }
 0x403   :  { %4182 = vmatprep.subr.bf16.mxu1 %v5781_v49  ;;  %v2466_v49 = vrot.slane %v6686_v8, %v6667_v11 }
 0x406   :  { %4183 = vmatpush1.bf16.msra.mxu1 %v5779_v50  ;;  %v5863_v50 = vld [vmem:[#allocation19 + $0x4d0] ss:$28 sps:$4 sm:$0xff]  }
 0x407   :  { %4184 = vmatprep.subr.bf16.mxu1 %v5787_v51  ;;  %v5866_v51 = vld [vmem:[#allocation19 + $0x4d8] ss:$28 sps:$4 sm:$0xff]  }
 0x40a   :  { %4185 = vmatpush1.bf16.msra.mxu1 %v5785_v52  ;;  %v5871_v52 = vld [vmem:[#allocation19 + $0x50c] ss:$28 sps:$4 sm:$0xff]  }
 0x40b   :  { %4186 = vmatprep.subr.bf16.mxu1 %v5793_v53  ;;  %v5874_v53 = vld [vmem:[#allocation19 + $0x514] ss:$28 sps:$4 sm:$0xff]  }
 0x40e   :  { %4187 = vmatpush1.bf16.msra.mxu1 %v5791_v54 }
 0x40f   :  { %4188 = vmatprep.subr.bf16.mxu1 %v5799_v55 }
 0x412   :  { %4189 = vmatpush1.bf16.msra.mxu1 %v5797_v56 }
 0x413   :  { %4190 = vmatprep.subr.bf16.mxu1 %v5805_v57 }
 0x416   :  { %4191 = vmatpush1.bf16.msra.mxu1 %v5803_v58  ;;  %v5869_v58 = vld [vmem:[#allocation19 + $0x508] ss:$28 sps:$4 sm:$0xff]  }
 0x417   :  { %4192 = vmatprep.subr.bf16.mxu1 %v5811_v59  ;;  %v5872_v59 = vld [vmem:[#allocation19 + $0x510] ss:$28 sps:$4 sm:$0xff]  }
 0x41a   :  { %4193 = vmatpush1.bf16.msra.mxu1 %v5809_v60 }
 0x41b   :  { %4194 = vmatprep.subr.bf16.mxu1 %v5817_v61  ;;  %v5877_v61 = vld [vmem:[#allocation19 + $0x544] ss:$28 sps:$4 sm:$0xff]  }
 0x41e   :  { %4195 = vmatpush1.bf16.msra.mxu1 %v5815_v0 }
 0x41f   :  { %4196 = vmatprep.subr.bf16.mxu1 %v5823_v1  ;;  %v5875_v1 = vld [vmem:[#allocation19 + $0x540] ss:$28 sps:$4 sm:$0xff]  }
 0x422   :  { %4197 = vmatpush1.bf16.msra.mxu1 %v5821_v5  ;;  %v5886_v5 = vld [vmem:[#allocation19 + $0x584] ss:$28 sps:$4 sm:$0xff]  }
 0x423   :  { %4207 = vmatprep.subr.bf16.mxu1 %v5829_v6  ;;  %v5881_v6 = vld [vmem:[#allocation19 + $0x578] ss:$28 sps:$4 sm:$0xff]  }
 0x498   :  { %v2665_v12 = vpop.f32.mrb[4].mxu1 }
 0x499   :  { %v2666_v13 = vadd.f32 %v2665_v12, %v2454_v9  ;;  %v2667_v14 = vpop.f32.mrb[5].mxu1  ;;  %v5889_v9 = vld [vmem:[#allocation19 + $0x5b4] ss:$28 sps:$4 sm:$0xff]  }
 0x49a   :  { %v2668_v15 = vadd.f32 %v2667_v14, %v2458_v10  ;;  %v2669_v16 = vpop.f32.mrb[6].mxu1  ;;  %v5892_v10 = vld [vmem:[#allocation19 + $0x5bc] ss:$28 sps:$4 sm:$0xff]   ;;  %v5887_v12 = vld [vmem:[#allocation19 + $0x5b0] ss:$28 sps:$4 sm:$0xff]  }
 0x49b   :  { %v2713_v17 = vmax.f32 %v2666_v13, 0.0  ;;  %v2670_v20 = vpop.f32.mrb[7].mxu1  ;;  %v5890_v13 = vld [vmem:[#allocation19 + $0x5b8] ss:$28 sps:$4 sm:$0xff]   ;;  %v5895_v14 = vld [vmem:[#allocation19 + $0x5ec] ss:$28 sps:$4 sm:$0xff]  }
 0x49c   :  { %v2714_v23 = vmax.f32 %v2668_v15, 0.0  ;;  %v5898_v15 = vld [vmem:[#allocation19 + $0x5f4] ss:$28 sps:$4 sm:$0xff]   ;;  %v5893_v16 = vld [vmem:[#allocation19 + $0x5e8] ss:$28 sps:$4 sm:$0xff]  }
 0x49d   :  { %v6694_v27 = vpack.c.bf16 %v2713_v17, %v2713_v17  ;;  %v5896_v17 = vld [vmem:[#allocation19 + $0x5f0] ss:$28 sps:$4 sm:$0xff]   ;;  %v5901_v20 = vld [vmem:[#allocation19 + $0x624] ss:$28 sps:$4 sm:$0xff]  }
 0x49e   :  { %v6692_v24 = vpack.c.bf16 %v2714_v23, %v2714_v23  ;;  %v5904_v23 = vld [vmem:[#allocation19 + $0x62c] ss:$28 sps:$4 sm:$0xff]  }
 0x4a0   :  { %4198 = vmatprep.mubr.bf16.mxu1 %v6692_v24  ;;  %4280 = vmatprep.mubr.bf16.mxu0 %v6692_v24 }
 0x4a1   :  { %4199 = vmatmul.mubr.bf16.vlgmr.msra.gmra.mrb[12].mxu1 %v6694_v27  ;;  %4281 = vmatmul.mubr.bf16.vlgmr.msra.gmra.mrb[8].mxu0 %v6694_v27 }
 0x4a2   :  { %4208 = vmatpush1.bf16.msra.mxu1 %v5827_v25  ;;  %4290 = vmatpush1.bf16.msra.mxu0 %v5830_v26  ;;  %v5899_v25 = vld [vmem:[#allocation19 + $0x620] ss:$28 sps:$4 sm:$0xff]   ;;  %v5902_v26 = vld [vmem:[#allocation19 + $0x628] ss:$28 sps:$4 sm:$0xff]  }
 0x4a3   :  { %4209 = vmatprep.subr.bf16.mxu1 %v5835_v28  ;;  %4291 = vmatprep.subr.bf16.mxu0 %v5838_v29  ;;  %v5907_v28 = vld [vmem:[#allocation19 + $0x65c] ss:$28 sps:$4 sm:$0xff]   ;;  %v5910_v29 = vld [vmem:[#allocation19 + $0x664] ss:$28 sps:$4 sm:$0xff]  }
 0x4a6   :  { %4210 = vmatpush1.bf16.msra.mxu1 %v5833_v30  ;;  %4292 = vmatpush1.bf16.msra.mxu0 %v5836_v22  ;;  %v5905_v30 = vld [vmem:[#allocation19 + $0x658] ss:$28 sps:$4 sm:$0xff]   ;;  %v5908_v22 = vld [vmem:[#allocation19 + $0x660] ss:$28 sps:$4 sm:$0xff]  }
 0x4a7   :  { %4211 = vmatprep.subr.bf16.mxu1 %v5841_v31  ;;  %4293 = vmatprep.subr.bf16.mxu0 %v5844_v32  ;;  %v2462_v31 = vrot.slane %v6686_v8, %v6678_v4  ;;  %v5913_v32 = vld [vmem:[#allocation19 + $0x694] ss:$28 sps:$4 sm:$0xff]  }
 0x4a8   :  { %v5925_v8 = vld [vmem:[#allocation19 + $0x14] ss:$28 sps:$4 sm:$0xff]  }
 0x4aa   :  { %4212 = vmatpush1.bf16.msra.mxu1 %v5839_v33  ;;  %4294 = vmatpush1.bf16.msra.mxu0 %v5842_v34  ;;  %v5916_v33 = vld [vmem:[#allocation19 + $0x69c] ss:$28 sps:$4 sm:$0xff]   ;;  %v5911_v34 = vld [vmem:[#allocation19 + $0x690] ss:$28 sps:$4 sm:$0xff]  }
 0x4ab   :  { %4213 = vmatprep.subr.bf16.mxu1 %v5847_v35  ;;  %4295 = vmatprep.subr.bf16.mxu0 %v5850_v36  ;;  %v5914_v35 = vld [vmem:[#allocation19 + $0x698] ss:$28 sps:$4 sm:$0xff]  }
 0x4ae   :  { %4214 = vmatpush1.bf16.msra.mxu1 %v5845_v37  ;;  %4296 = vmatpush1.bf16.msra.mxu0 %v5848_v38  ;;  %v5919_v37 = vld [vmem:[#allocation19 + $0x6cc] ss:$28 sps:$4 sm:$0xff]   ;;  %v5922_v38 = vld [vmem:[#allocation19 + $0x6d4] ss:$28 sps:$4 sm:$0xff]  }
 0x4af   :  { %4215 = vmatprep.subr.bf16.mxu1 %v5853_v39  ;;  %4297 = vmatprep.subr.bf16.mxu0 %v5856_v40  ;;  %v5917_v39 = vld [vmem:[#allocation19 + $0x6c8] ss:$28 sps:$4 sm:$0xff]   ;;  %v5920_v40 = vld [vmem:[#allocation19 + $0x6d0] ss:$28 sps:$4 sm:$0xff]  }
 0x4b2   :  { %4216 = vmatpush1.bf16.msra.mxu1 %v5851_v41  ;;  %4298 = vmatpush1.bf16.msra.mxu0 %v5854_v42  ;;  %v5926_v42 = vld [vmem:[#allocation19 + $0x1d8] ss:$28 sps:$4 sm:$0xff]  }
 0x4b3   :  { %4217 = vmatprep.subr.bf16.mxu1 %v5859_v43  ;;  %4299 = vmatprep.subr.bf16.mxu0 %v5862_v44  ;;  %v5923_v43 = vld [vmem:[#allocation19 + $0x10] ss:$28 sps:$4 sm:$0xff]  }
 0x4b6   :  { %4218 = vmatpush1.bf16.msra.mxu1 %v5857_v45  ;;  %4300 = vmatpush1.bf16.msra.mxu0 %v5860_v46  ;;  %v5927_v45 = vld [vmem:[#allocation19 + $0x18] ss:$28 sps:$4 sm:$0xff]   ;;  %v5930_v46 = vld [vmem:[#allocation19 + $0x4c] ss:$28 sps:$4 sm:$0xff]  }
 0x4b7   :  { %4219 = vmatprep.subr.bf16.mxu1 %v5865_v47  ;;  %4301 = vmatprep.subr.bf16.mxu0 %v5868_v48  ;;  %v5931_v47 = vld [vmem:[#allocation19 + $0x210] ss:$28 sps:$4 sm:$0xff]   ;;  %v5928_v48 = vld [vmem:[#allocation19 + $0x48] ss:$28 sps:$4 sm:$0xff]  }
 0x4b8   :  { %v6702_v54 = vpop.f32.mrb[8].mxu1 }
 0x4b9   :  { %v2708_v55 = vpop.f32.mrb[9].mxu1  ;;  %v2707_v36 = vadd.f32 %v6702_v54, %v2462_v31  ;;  %v5940_v54 = vld [vmem:[#allocation19 + $0xbc] ss:$28 sps:$4 sm:$0xff]  }
 0x4ba   :  { %v2709_v56 = vadd.f32 %v2708_v55, %v2466_v49  ;;  %v2710_v57 = vpop.f32.mrb[10].mxu1  ;;  %4220 = vmatpush1.bf16.msra.mxu1 %v5863_v50  ;;  %4302 = vmatpush1.bf16.msra.mxu0 %v5866_v51  ;;  %v5932_v49 = vld [vmem:[#allocation19 + $0x50] ss:$28 sps:$4 sm:$0xff]   ;;  %v5935_v50 = vld [vmem:[#allocation19 + $0x84] ss:$28 sps:$4 sm:$0xff]  }
 0x4bb   :  { %v2711_v60 = vpop.f32.mrb[11].mxu1  ;;  %4221 = vmatprep.subr.bf16.mxu1 %v5871_v52  ;;  %4303 = vmatprep.subr.bf16.mxu0 %v5874_v53  ;;  %v2715_v41 = vmax.f32 %v2707_v36, 0.0  ;;  %v5936_v51 = vld [vmem:[#allocation19 + $0x248] ss:$28 sps:$4 sm:$0xff]   ;;  %v5933_v52 = vld [vmem:[#allocation19 + $0x80] ss:$28 sps:$4 sm:$0xff]  }
 0x4bc   :  { %v2716_v63 = vmax.f32 %v2709_v56, 0.0  ;;  %v5937_v53 = vld [vmem:[#allocation19 + $0x88] ss:$28 sps:$4 sm:$0xff]   ;;  %v5941_v55 = vld [vmem:[#allocation19 + $0x280] ss:$28 sps:$4 sm:$0xff]  }
 0x4bd   :  { %v6711_v44 = vpack.c.bf16 %v2715_v41, %v2715_v41  ;;  %v5938_v56 = vld [vmem:[#allocation19 + $0xb8] ss:$28 sps:$4 sm:$0xff]   ;;  %v5942_v57 = vld [vmem:[#allocation19 + $0xc0] ss:$28 sps:$4 sm:$0xff]   ;;  %v5983_v36 = vld [vmem:[#allocation19 + $0x2b0] ss:$28 sps:$4 sm:$0xff]  }
 0x4be   :  { %v6704_v0 = vpack.c.bf16 %v2716_v63, %v2716_v63  ;;  %4222 = vmatpush1.bf16.msra.mxu1 %v5869_v58  ;;  %4304 = vmatpush1.bf16.msra.mxu0 %v5872_v59  ;;  %v5945_v58 = vld [vmem:[#allocation19 + $0xf4] ss:$28 sps:$4 sm:$0xff]   ;;  %v5948_v63 = vld [vmem:[#allocation19 + $0x128] ss:$28 sps:$4 sm:$0xff]   ;;  %v5981_v31 = vld [vmem:[#allocation19 + $0x600] ss:$28 sps:$4 sm:$0xff]  }
 0x4bf   :  { %4223 = vmatprep.subr.bf16.mxu1 %v5877_v61  ;;  %4305 = vmatprep.subr.bf16.mxu0 %v5880_v62  ;;  %v5943_v59 = vld [vmem:[#allocation19 + $0xf0] ss:$28 sps:$4 sm:$0xff]   ;;  %v5947_v60 = vld [vmem:[#allocation19 + $0xf8] ss:$28 sps:$4 sm:$0xff]  }
 0x4c0   :  { %4239 = vmatprep.mubr.bf16.mxu1 %v6704_v0  ;;  %4321 = vmatprep.mubr.bf16.mxu0 %v6704_v0  ;;  %v5950_v61 = vld [vmem:[#allocation19 + $0x12c] ss:$28 sps:$4 sm:$0xff]  }
 0x4c1   :  { %v5951_v62 = vld [vmem:[#allocation19 + $0x2f0] ss:$28 sps:$4 sm:$0xff]  }
 0x4c2   :  { %4224 = vmatpush1.bf16.msra.mxu1 %v5875_v1  ;;  %4306 = vmatpush1.bf16.msra.mxu0 %v5878_v2  ;;  %v5952_v1 = vld [vmem:[#allocation19 + $0x130] ss:$28 sps:$4 sm:$0xff]   ;;  %v5955_v2 = vld [vmem:[#allocation19 + $0x164] ss:$28 sps:$4 sm:$0xff]  }
 0x4c3   :  { %4225 = vmatprep.subr.bf16.mxu1 %v5883_v3  ;;  %4307 = vmatprep.subr.bf16.mxu0 %v5886_v5  ;;  %v5956_v3 = vld [vmem:[#allocation19 + $0x328] ss:$28 sps:$4 sm:$0xff]   ;;  %v5953_v5 = vld [vmem:[#allocation19 + $0x160] ss:$28 sps:$4 sm:$0xff]   ;;  %v5992_v41 = vld [vmem:[#allocation19 + $0x4b0] ss:$28 sps:$4 sm:$0xff]  }
 0x4c6   :  { %4226 = vmatpush1.bf16.msra.mxu1 %v5881_v6  ;;  %4308 = vmatpush1.bf16.msra.mxu0 %v5884_v7  ;;  %v5957_v6 = vld [vmem:[#allocation19 + $0x168] ss:$28 sps:$4 sm:$0xff]   ;;  %v5960_v7 = vld [vmem:[#allocation19 + $0x19c] ss:$28 sps:$4 sm:$0xff]  }
 0x4c7   :  { %4227 = vmatprep.subr.bf16.mxu1 %v5889_v9  ;;  %4309 = vmatprep.subr.bf16.mxu0 %v5892_v10  ;;  %v5961_v9 = vld [vmem:[#allocation19 + $0x360] ss:$28 sps:$4 sm:$0xff]   ;;  %v5958_v10 = vld [vmem:[#allocation19 + $0x198] ss:$28 sps:$4 sm:$0xff]  }
 0x4ca   :  { %4228 = vmatpush1.bf16.msra.mxu1 %v5887_v12  ;;  %4310 = vmatpush1.bf16.msra.mxu0 %v5890_v13  ;;  %v5962_v12 = vld [vmem:[#allocation19 + $0x1a0] ss:$28 sps:$4 sm:$0xff]   ;;  %v5965_v13 = vld [vmem:[#allocation19 + $0x1d4] ss:$28 sps:$4 sm:$0xff]  }
 0x4cb   :  { %4229 = vmatprep.subr.bf16.mxu1 %v5895_v14  ;;  %4311 = vmatprep.subr.bf16.mxu0 %v5898_v15  ;;  %v5966_v14 = vld [vmem:[#allocation19 + $0x558] ss:$28 sps:$4 sm:$0xff]   ;;  %v5963_v15 = vld [vmem:[#allocation19 + $0x1d0] ss:$28 sps:$4 sm:$0xff]  }
 0x4ce   :  { %4230 = vmatpush1.bf16.msra.mxu1 %v5893_v16  ;;  %4312 = vmatpush1.bf16.msra.mxu0 %v5896_v17  ;;  %v5967_v16 = vld [vmem:[#allocation19 + $0x398] ss:$28 sps:$4 sm:$0xff]   ;;  %v5970_v17 = vld [vmem:[#allocation19 + $0x20c] ss:$28 sps:$4 sm:$0xff]  }
 0x4cf   :  { %4231 = vmatprep.subr.bf16.mxu1 %v5901_v20  ;;  %4313 = vmatprep.subr.bf16.mxu0 %v5904_v23  ;;  %v5971_v20 = vld [vmem:[#allocation19 + $0x590] ss:$28 sps:$4 sm:$0xff]   ;;  %v5968_v23 = vld [vmem:[#allocation19 + $0x208] ss:$28 sps:$4 sm:$0xff]  }
 0x4d2   :  { %4232 = vmatpush1.bf16.msra.mxu1 %v5899_v25  ;;  %4314 = vmatpush1.bf16.msra.mxu0 %v5902_v26  ;;  %v5972_v25 = vld [vmem:[#allocation19 + $0x3d0] ss:$28 sps:$4 sm:$0xff]   ;;  %v5975_v26 = vld [vmem:[#allocation19 + $0x244] ss:$28 sps:$4 sm:$0xff]  }
 0x4d3   :  { %4233 = vmatprep.subr.bf16.mxu1 %v5907_v28  ;;  %4315 = vmatprep.subr.bf16.mxu0 %v5910_v29  ;;  %v5976_v28 = vld [vmem:[#allocation19 + $0x5c8] ss:$28 sps:$4 sm:$0xff]   ;;  %v5973_v29 = vld [vmem:[#allocation19 + $0x240] ss:$28 sps:$4 sm:$0xff]  }
 0x4d6   :  { %4234 = vmatpush1.bf16.msra.mxu1 %v5905_v30  ;;  %4316 = vmatpush1.bf16.msra.mxu0 %v5908_v22  ;;  %v5977_v30 = vld [vmem:[#allocation19 + $0x408] ss:$28 sps:$4 sm:$0xff]   ;;  %v5980_v22 = vld [vmem:[#allocation19 + $0x27c] ss:$28 sps:$4 sm:$0xff]  }
 0x4d7   :  { %4235 = vmatprep.subr.bf16.mxu1 %v5913_v32  ;;  %4317 = vmatprep.subr.bf16.mxu0 %v5916_v33  ;;  %v5978_v32 = vld [vmem:[#allocation19 + $0x278] ss:$28 sps:$4 sm:$0xff]   ;;  %v5982_v33 = vld [vmem:[#allocation19 + $0x440] ss:$28 sps:$4 sm:$0xff]  }
 0x4da   :  { %4236 = vmatpush1.bf16.msra.mxu1 %v5911_v34  ;;  %4318 = vmatpush1.bf16.msra.mxu0 %v5914_v35  ;;  %v5985_v34 = vld [vmem:[#allocation19 + $0x2b4] ss:$28 sps:$4 sm:$0xff]  }
 0x4db   :  { %4237 = vmatprep.subr.bf16.mxu1 %v5919_v37  ;;  %4319 = vmatprep.subr.bf16.mxu0 %v5922_v38  ;;  %v5986_v35 = vld [vmem:[#allocation19 + $0x638] ss:$28 sps:$4 sm:$0xff]   ;;  %v5990_v38 = vld [vmem:[#allocation19 + $0x2ec] ss:$28 sps:$4 sm:$0xff]  }
 0x4dc   :  { %v5987_v37 = vld [vmem:[#allocation19 + $0x478] ss:$28 sps:$4 sm:$0xff]  }
 0x4de   :  { %4238 = vmatpush1.bf16.msra.mxu1 %v5917_v39  ;;  %4320 = vmatpush1.bf16.msra.mxu0 %v5920_v40  ;;  %v5991_v39 = vld [vmem:[#allocation19 + $0x670] ss:$28 sps:$4 sm:$0xff]   ;;  %v5988_v40 = vld [vmem:[#allocation19 + $0x2e8] ss:$28 sps:$4 sm:$0xff]  }
 0x4df   :  { %4330 = vmatprep.subr.bf16.mxu1 %v5925_v8  ;;  %5127 = vmatprep.subr.bf16.mxu0 %v5926_v42  ;;  %v5995_v8 = vld [vmem:[#allocation19 + $0x324] ss:$28 sps:$4 sm:$0xff]  }
 0x4e0   :  { %v5996_v42 = vld [vmem:[#allocation19 + $0x6a8] ss:$28 sps:$4 sm:$0xff]  }
 0x4e1   :  { %4240 = vmatmul.mubr.bf16.vlgmr.msra.gmra.mrb[12].mxu1 %v6711_v44  ;;  %4322 = vmatmul.mubr.bf16.vlgmr.msra.gmra.mrb[8].mxu0 %v6711_v44 }
 0x4e2   :  { %4331 = vmatpush1.bf16.msra.mxu1 %v5923_v43  ;;  %4362 = vmatprep.mubr.bf16.mxu1 %v6692_v24  ;;  %v5993_v43 = vld [vmem:[#allocation19 + $0x320] ss:$28 sps:$4 sm:$0xff]  }
 0x4e3   :  { %5128 = vmatpush3.bf16.msra.mxu0 %v5927_v45  ;;  %4444 = vmatprep.mubr.bf16.mxu0 %v6692_v24  ;;  %v5946_v24 = vld [vmem:[#allocation19 + $0x2b8] ss:$28 sps:$4 sm:$0xff]   ;;  %v5997_v45 = vld [vmem:[#allocation19 + $0x4e8] ss:$28 sps:$4 sm:$0xff]  }
 0x4e4   :  { %4332 = vmatprep.subr.bf16.mxu1 %v5930_v46  ;;  %5129 = vmatprep.subr.bf16.mxu0 %v5931_v47  ;;  %v6000_v46 = vld [vmem:[#allocation19 + $0x35c] ss:$28 sps:$4 sm:$0xff]  }
 0x4e5   :  { %v6001_v47 = vld [vmem:[#allocation19 + $0x6e0] ss:$28 sps:$4 sm:$0xff]  }
 0x4e6   :  { %4333 = vmatpush1.bf16.msra.mxu1 %v5928_v48  ;;  %v5998_v48 = vld [vmem:[#allocation19 + $0x358] ss:$28 sps:$4 sm:$0xff]  }
 0x4e7   :  { %5130 = vmatpush3.bf16.msra.mxu0 %v5932_v49  ;;  %4334 = vmatprep.subr.bf16.mxu1 %v5935_v50  ;;  %v6002_v49 = vld [vmem:[#allocation19 + $0x520] ss:$28 sps:$4 sm:$0xff]   ;;  %v6005_v50 = vld [vmem:[#allocation19 + $0x394] ss:$28 sps:$4 sm:$0xff]  }
 0x4e8   :  { %5131 = vmatprep.subr.bf16.mxu0 %v5936_v51  ;;  %v6003_v51 = vld [vmem:[#allocation19 + $0x390] ss:$28 sps:$4 sm:$0xff]  }
 0x4ea   :  { %4335 = vmatpush1.bf16.msra.mxu1 %v5933_v52  ;;  %v6008_v52 = vld [vmem:[#allocation19 + $0x3cc] ss:$28 sps:$4 sm:$0xff]  }
 0x4eb   :  { %5132 = vmatpush3.bf16.msra.mxu0 %v5937_v53  ;;  %4336 = vmatprep.subr.bf16.mxu1 %v5940_v54  ;;  %v6006_v53 = vld [vmem:[#allocation19 + $0x3c8] ss:$28 sps:$4 sm:$0xff]  }
 0x4ec   :  { %5133 = vmatprep.subr.bf16.mxu0 %v5941_v55  ;;  %v6011_v54 = vld [vmem:[#allocation19 + $0x404] ss:$28 sps:$4 sm:$0xff]  }
 0x4ed   :  { %v6009_v55 = vld [vmem:[#allocation19 + $0x400] ss:$28 sps:$4 sm:$0xff]  }
 0x4ee   :  { %4337 = vmatpush1.bf16.msra.mxu1 %v5938_v56  ;;  %v6014_v56 = vld [vmem:[#allocation19 + $0x43c] ss:$28 sps:$4 sm:$0xff]  }
 0x4ef   :  { %5134 = vmatpush3.bf16.msra.mxu0 %v5942_v57  ;;  %4338 = vmatprep.subr.bf16.mxu1 %v5945_v58  ;;  %v6012_v57 = vld [vmem:[#allocation19 + $0x438] ss:$28 sps:$4 sm:$0xff]  }
 0x4f0   :  { %5135 = vmatprep.subr.bf16.mxu0 %v5946_v24  ;;  %v6017_v58 = vld [vmem:[#allocation19 + $0x474] ss:$28 sps:$4 sm:$0xff]  }
 0x4f1   :  { %v6015_v24 = vld [vmem:[#allocation19 + $0x470] ss:$28 sps:$4 sm:$0xff]  }
 0x4f2   :  { %4339 = vmatpush1.bf16.msra.mxu1 %v5943_v59  ;;  %v6018_v59 = vld [vmem:[#allocation19 + $0x4a8] ss:$28 sps:$4 sm:$0xff]  }
 0x4f3   :  { %5136 = vmatpush3.bf16.msra.mxu0 %v5947_v60  ;;  %4340 = vmatprep.subr.bf16.mxu1 %v5950_v61  ;;  %v6023_v60 = vld [vmem:[#allocation19 + $0x4e4] ss:$28 sps:$4 sm:$0xff]   ;;  %v6026_v61 = vld [vmem:[#allocation19 + $0x51c] ss:$28 sps:$4 sm:$0xff]  }
 0x4f4   :  { %5137 = vmatprep.subr.bf16.mxu0 %v5951_v62  ;;  %v6024_v62 = vld [vmem:[#allocation19 + $0x518] ss:$28 sps:$4 sm:$0xff]  }
 0x4f6   :  { %4341 = vmatpush1.bf16.msra.mxu1 %v5948_v63  ;;  %v6029_v63 = vld [vmem:[#allocation19 + $0x554] ss:$28 sps:$4 sm:$0xff]  }
 0x4f7   :  { %5138 = vmatpush3.bf16.msra.mxu0 %v5952_v1  ;;  %4342 = vmatprep.subr.bf16.mxu1 %v5955_v2  ;;  %v6027_v1 = vld [vmem:[#allocation19 + $0x550] ss:$28 sps:$4 sm:$0xff]  }
 0x4f8   :  { %5139 = vmatprep.subr.bf16.mxu0 %v5956_v3  ;;  %v6032_v2 = vld [vmem:[#allocation19 + $0x58c] ss:$28 sps:$4 sm:$0xff]  }
 0x4f9   :  { %v6030_v3 = vld [vmem:[#allocation19 + $0x588] ss:$28 sps:$4 sm:$0xff]  }
 0x4fa   :  { %4343 = vmatpush1.bf16.msra.mxu1 %v5953_v5  ;;  %v6035_v5 = vld [vmem:[#allocation19 + $0x5c4] ss:$28 sps:$4 sm:$0xff]  }
 0x4fb   :  { %5140 = vmatpush3.bf16.msra.mxu0 %v5957_v6  ;;  %4344 = vmatprep.subr.bf16.mxu1 %v5960_v7  ;;  %v6033_v6 = vld [vmem:[#allocation19 + $0x5c0] ss:$28 sps:$4 sm:$0xff]  }
 0x4fc   :  { %5141 = vmatprep.subr.bf16.mxu0 %v5961_v9  ;;  %v6038_v7 = vld [vmem:[#allocation19 + $0x5fc] ss:$28 sps:$4 sm:$0xff]  }
 0x4fd   :  { %v6036_v9 = vld [vmem:[#allocation19 + $0x5f8] ss:$28 sps:$4 sm:$0xff]  }
 0x4fe   :  { %4345 = vmatpush1.bf16.msra.mxu1 %v5958_v10  ;;  %v6041_v10 = vld [vmem:[#allocation19 + $0x634] ss:$28 sps:$4 sm:$0xff]  }
 0x4ff   :  { %5142 = vmatpush3.bf16.msra.mxu0 %v5962_v12  ;;  %4346 = vmatprep.subr.bf16.mxu1 %v5965_v13  ;;  %v6039_v12 = vld [vmem:[#allocation19 + $0x630] ss:$28 sps:$4 sm:$0xff]  }
 0x500   :  { %5149 = vmatprep.subr.bf16.mxu0 %v5966_v14  ;;  %v6044_v13 = vld [vmem:[#allocation19 + $0x66c] ss:$28 sps:$4 sm:$0xff]  }
 0x501   :  { %v6042_v14 = vld [vmem:[#allocation19 + $0x668] ss:$28 sps:$4 sm:$0xff]  }
 0x502   :  { %4445 = vmatmul.mubr.bf16.vlgmr.msra.gmra.mrb[12].mxu0 %v6694_v27  ;;  %4347 = vmatpush1.bf16.msra.mxu1 %v5963_v15  ;;  %v6047_v15 = vld [vmem:[#allocation19 + $0x6a4] ss:$28 sps:$4 sm:$0xff]  }
 0x503   :  { %5150 = vmatpush3.bf16.msra.mxu0 %v5967_v16  ;;  %4484 = vmatprep.mubr.bf16.mxu0 %v6704_v0  ;;  %v6045_v16 = vld [vmem:[#allocation19 + $0x6a0] ss:$28 sps:$4 sm:$0xff]  }
 0x504   :  { %4348 = vmatprep.subr.bf16.mxu1 %v5970_v17  ;;  %5151 = vmatprep.subr.bf16.mxu0 %v5971_v20  ;;  %v6050_v17 = vld [vmem:[#allocation19 + $0x6dc] ss:$28 sps:$4 sm:$0xff]  }
 0x505   :  { %v6048_v20 = vld [vmem:[#allocation19 + $0x6d8] ss:$28 sps:$4 sm:$0xff]  }
 0x506   :  { %4349 = vmatpush1.bf16.msra.mxu1 %v5968_v23  ;;  %v6723_v23 = vld [vmem:[#allocation20] sm:$0xff] }
 0x507   :  { %5152 = vmatpush3.bf16.msra.mxu0 %v5972_v25  ;;  %4350 = vmatprep.subr.bf16.mxu1 %v5975_v26  ;;  %v2982_v25 = vrot.slane %v6723_v23, %v6659_v19  ;;  %v2990_v26 = vrot.slane %v6723_v23, %v6678_v4 }
 0x508   :  { %5153 = vmatprep.subr.bf16.mxu0 %v5976_v28  ;;  %v2986_v28 = vrot.slane %v6723_v23, %v6664_v21 }
 0x50a   :  { %4351 = vmatpush1.bf16.msra.mxu1 %v5973_v29  ;;  %v2994_v29 = vrot.slane %v6723_v23, %v6667_v11 }
 0x50b   :  { %5154 = vmatpush3.bf16.msra.mxu0 %v5977_v30  ;;  %4352 = vmatprep.subr.bf16.mxu1 %v5980_v22 }
 0x50c   :  { %5155 = vmatprep.subr.bf16.mxu0 %v5981_v31 }
 0x50e   :  { %4353 = vmatpush1.bf16.msra.mxu1 %v5978_v32 }
 0x50f   :  { %5156 = vmatpush3.bf16.msra.mxu0 %v5982_v33  ;;  %4354 = vmatprep.subr.bf16.mxu1 %v5985_v34 }
 0x510   :  { %5157 = vmatprep.subr.bf16.mxu0 %v5986_v35 }
 0x512   :  { %4355 = vmatpush1.bf16.msra.mxu1 %v5983_v36 }
 0x513   :  { %5158 = vmatpush3.bf16.msra.mxu0 %v5987_v37  ;;  %4356 = vmatprep.subr.bf16.mxu1 %v5990_v38 }
 0x514   :  { %5159 = vmatprep.subr.bf16.mxu0 %v5991_v39 }
 0x516   :  { %4357 = vmatpush1.bf16.msra.mxu1 %v5988_v40 }
 0x517   :  { %5160 = vmatpush3.bf16.msra.mxu0 %v5992_v41  ;;  %4358 = vmatprep.subr.bf16.mxu1 %v5995_v8 }
 0x518   :  { %5161 = vmatprep.subr.bf16.mxu0 %v5996_v42 }
 0x51a   :  { %4359 = vmatpush1.bf16.msra.mxu1 %v5993_v43 }
 0x51b   :  { %5162 = vmatpush3.bf16.msra.mxu0 %v5997_v45  ;;  %4360 = vmatprep.subr.bf16.mxu1 %v6000_v46 }
 0x51c   :  { %5163 = vmatprep.subr.bf16.mxu0 %v6001_v47 }
 0x51e   :  { %4361 = vmatpush1.bf16.msra.mxu1 %v5998_v48 }
 0x51f   :  { %5164 = vmatpush3.bf16.msra.mxu0 %v6002_v49  ;;  %4371 = vmatprep.subr.bf16.mxu1 %v6005_v50 }
 0x521   :  { %4363 = vmatmul.mubr.bf16.vlgmr.msra.gmra.mrb[16].mxu1 %v6694_v27  ;;  %v6020_v27 = vld [vmem:[#allocation19 + $0x4ac] ss:$28 sps:$4 sm:$0xff]  }
 0x522   :  { %4485 = vmatmul.mubr.bf16.vlgmr.msra.gmra.mrb[16].mxu0 %v6711_v44  ;;  %4372 = vmatpush1.bf16.msra.mxu1 %v6003_v51 }
 0x523   :  { %4403 = vmatprep.mubr.bf16.mxu1 %v6704_v0  ;;  %4373 = vmatprep.subr.bf16.mxu1 %v6008_v52  ;;  %v6021_v0 = vld [vmem:[#allocation19 + $0x4e0] ss:$28 sps:$4 sm:$0xff]  }
 0x526   :  { %4374 = vmatpush1.bf16.msra.mxu1 %v6006_v53 }
 0x527   :  { %4375 = vmatprep.subr.bf16.mxu1 %v6011_v54 }
 0x52a   :  { %4376 = vmatpush1.bf16.msra.mxu1 %v6009_v55 }
 0x52b   :  { %4377 = vmatprep.subr.bf16.mxu1 %v6014_v56 }
 0x52e   :  { %4378 = vmatpush1.bf16.msra.mxu1 %v6012_v57 }
 0x52f   :  { %4379 = vmatprep.subr.bf16.mxu1 %v6017_v58 }
 0x532   :  { %4380 = vmatpush1.bf16.msra.mxu1 %v6015_v24 }
 0x533   :  { %4381 = vmatprep.subr.bf16.mxu1 %v6020_v27 }
 0x536   :  { %4382 = vmatpush1.bf16.msra.mxu1 %v6018_v59 }
 0x537   :  { %4383 = vmatprep.subr.bf16.mxu1 %v6023_v60 }
 0x53a   :  { %4384 = vmatpush1.bf16.msra.mxu1 %v6021_v0 }
 0x53b   :  { %4385 = vmatprep.subr.bf16.mxu1 %v6026_v61 }
 0x53e   :  { %4386 = vmatpush1.bf16.msra.mxu1 %v6024_v62 }
 0x53f   :  { %4387 = vmatprep.subr.bf16.mxu1 %v6029_v63 }
 0x542   :  { %4388 = vmatpush1.bf16.msra.mxu1 %v6027_v1 }
 0x543   :  { %4389 = vmatprep.subr.bf16.mxu1 %v6032_v2 }
 0x546   :  { %4390 = vmatpush1.bf16.msra.mxu1 %v6030_v3 }
 0x547   :  { %4391 = vmatprep.subr.bf16.mxu1 %v6035_v5 }
 0x54a   :  { %4392 = vmatpush1.bf16.msra.mxu1 %v6033_v6 }
 0x54b   :  { %4393 = vmatprep.subr.bf16.mxu1 %v6038_v7 }
 0x54e   :  { %4394 = vmatpush1.bf16.msra.mxu1 %v6036_v9 }
 0x54f   :  { %4395 = vmatprep.subr.bf16.mxu1 %v6041_v10 }
 0x552   :  { %4396 = vmatpush1.bf16.msra.mxu1 %v6039_v12 }
 0x553   :  { %4397 = vmatprep.subr.bf16.mxu1 %v6044_v13 }
 0x556   :  { %4398 = vmatpush1.bf16.msra.mxu1 %v6042_v14 }
 0x557   :  { %4399 = vmatprep.subr.bf16.mxu1 %v6047_v15 }
 0x55a   :  { %4400 = vmatpush1.bf16.msra.mxu1 %v6045_v16 }
 0x55b   :  { %4401 = vmatprep.subr.bf16.mxu1 %v6050_v17 }
 0x55e   :  { %4402 = vmatpush1.bf16.msra.mxu1 %v6048_v20 }
 0x561   :  { %4404 = vmatmul.mubr.bf16.vlgmr.msra.gmra.mrb[16].mxu1 %v6711_v44 }
 0x5b4   :  { %v4241_v30 = vpop.f32.mrb[12].mxu1  ;;  %v4323_v22 = vpop.f32.mrb[8].mxu0 }
 0x5b5   :  { %v5177_v31 = vadd.f32 %v4241_v30, %v2982_v25  ;;  %v5179_v32 = vadd.f32 %v4323_v22, %v2990_v26  ;;  %v4243_v33 = vpop.f32.mrb[13].mxu1  ;;  %v4325_v44 = vpop.f32.mrb[9].mxu0 }
 0x5b6   :  { %v5178_v34 = vadd.f32 %v4243_v33, %v2986_v28  ;;  %v5180_v35 = vadd.f32 %v4325_v44, %v2994_v29  ;;  %v4245_v36 = vpop.f32.mrb[14].mxu1  ;;  %v4327_v37 = vpop.f32.mrb[10].mxu0 }
 0x5b7   :  { %6053 = vtanh.f32 %v5177_v31  ;;  %v4246_v19 = vpop.f32.mrb[15].mxu1  ;;  %v4328_v38 = vpop.f32.mrb[11].mxu0 }
 0x5b8   :  { %6055 = vtanh.f32 %v5179_v32 }
 0x5b9   :  { %6057 = vtanh.f32 %v5178_v34 }
 0x5ba   :  { %6059 = vtanh.f32 %v5180_v35 }
 0x5bb   :  { %6342 = shalt.err (!%p6339_p2)
}
 0x5bc   :  { %s6343_s20 = scalar_lea.hbm %s6775_s12, 256 }
 0x5bd   :  { %p6344_p3 = scmp.ne.s32.totalorder %s6775_s12, %s6343_s20  ;;  %p6347_p4 = scmp.lt.u32.totalorder %s6343_s20, %s6775_s12 }
 0x5bf   :  { %p6349_p5 = pnand %p6347_p4, %p6344_p3 }
 0x5c1   :  { %6352 = shalt.err (!%p6349_p5)
}
 0x5c2   :  { %4541 = dma.vmem_to_hbm [thread:$0]  %s4539_s6, 256, %s6775_s12, [#allocation4]   ;;  %v6054_v21 = vpop.eup %6053  ;;  %v3005_v47 = vsub.s32 6, %v6656_v18  ;;  %v2997_v58 = vsub.s32 4, %v6656_v18  ;;  %v3001_v24 = vsub.s32 5, %v6656_v18 }
 0x5c3   :  { %v6056_v11 = vpop.eup %6055  ;;  %s6413_s12 = smov [#allocation23]  }
 0x5c4   :  { %v6058_v4 = vpop.eup %6057  ;;  %v3006_v48 = vrot.slane %v6723_v23, %v3005_v47  ;;  %v2998_v27 = vrot.slane %v6723_v23, %v2997_v58  ;;  %v3002_v59 = vrot.slane %v6723_v23, %v3001_v24  ;;  %s4548_s8 = sshll.u32 %s6413_s12, 4  ;;  %s4549_s8 = int_to_ptr.vmem [resolvable:$true] %s4548_s8 }
 0x5c5   :  { %v6060_v39 = vpop.eup %6059  ;;  %v5123_v40 = vpack.c.bf16 %v6058_v4, %v6054_v21  ;;  %s6353_s2 = scalar_lea.vmem %s4549_s8, 448  ;;  %p6358_p7 = scmp.lt.s32.totalorder %s4549_s8, %s4549_s8 }
 0x5c6   :  { %v5124_v41 = vpack.c.bf16 %v6060_v39, %v6056_v11  ;;  %p6354_p6 = scmp.ne.s32.totalorder %s4549_s8, %s6353_s2  ;;  %p6359_p8 = scmp.lt.s32.totalorder %s6353_s2, %s6353_s2 }
 0x5c7   :  { %4528 = vst [vmem:[#allocation23] sm:$0xff] %v5123_v40 }
 0x5c8   :  { %4529 = vst [vmem:[#allocation23 + $0x8] sm:$0xff] %v5124_v41  ;;  %p6360_p9 = por %p6359_p8, %p6358_p7 }
 0x5ca   :  { %p6361_p10 = pnand %p6360_p9, %p6354_p6 }
 0x5d5   :  { %v5143_v8 = vpop.f32.mrb[12].mxu0 }
 0x5d6   :  { %v5144_v42 = vpop.f32.mrb[13].mxu0 }
 0x5d7   :  { %v5145_v43 = vadd.f32 %v5144_v42, %v5143_v8  ;;  %v5146_v45 = vpop.f32.mrb[14].mxu0 }
 0x5d8   :  { %v5147_v46 = vpop.f32.mrb[15].mxu0 }
 0x5d9   :  { %v4447_v51 = vadd.f32 %v5145_v43, %v3006_v48 }
 0x5f5   :  { %v5165_v49 = vpop.f32.mrb[16].mxu0 }
 0x5f6   :  { %v5166_v50 = vpop.f32.mrb[17].mxu0 }
 0x5f7   :  { %v5167_v52 = vadd.f32 %v5166_v50, %v5165_v49  ;;  %v5168_v53 = vpop.f32.mrb[18].mxu0 }
 0x5f8   :  { %v5169_v54 = vpop.f32.mrb[19].mxu0 }
 0x5f9   :  { %v4487_v55 = vadd.f32 %v5167_v52, %v4447_v51 }
 0x5fb   :  { %6061 = vtanh.f32 %v4487_v55 }
 0x605   :  { %v6062_v56 = vpop.eup %6061 }
 0x606   :  { %v5126_v57 = vpack.c.bf16 %v6062_v56, %v6062_v56 }
 0x608   :  { %4531 = vst [vmem:[#allocation23 + $0x18] sm:$0xf] %v5126_v57 }
 0x634   :  { %v4405_v60 = vpop.f32.mrb[16].mxu1 }
 0x635   :  { %v5181_v0 = vadd.f32 %v4405_v60, %v2998_v27  ;;  %v4407_v61 = vpop.f32.mrb[17].mxu1 }
 0x636   :  { %v5182_v62 = vadd.f32 %v4407_v61, %v3002_v59  ;;  %v4409_v63 = vpop.f32.mrb[18].mxu1 }
 0x637   :  { %6063 = vtanh.f32 %v5181_v0  ;;  %v4410_v1 = vpop.f32.mrb[19].mxu1 }
 0x638   :  { %6065 = vtanh.f32 %v5182_v62 }
 0x641   :  { %v6064_v2 = vpop.eup %6063 }
 0x642   :  { %v6066_v3 = vpop.eup %6065 }
 0x643   :  { %v5125_v5 = vpack.c.bf16 %v6066_v3, %v6064_v2 }
 0x645   :  { %4530 = vst [vmem:[#allocation23 + $0x10] sm:$0xff] %v5125_v5 }
 0x646   :  { %6364 = shalt.err (!%p6361_p10)
}
 0x647   :  { %s6365_s17 = scalar_lea.hbm %s6776_s13, 448 }
 0x648   :  { %p6366_p11 = scmp.ne.s32.totalorder %s6776_s13, %s6365_s17  ;;  %p6369_p12 = scmp.lt.u32.totalorder %s6365_s17, %s6776_s13 }
 0x64a   :  { %p6371_p13 = pnand %p6369_p12, %p6366_p11 }
 0x64c   :  { %6374 = shalt.err (!%p6371_p13)
}
 0x64d   :  { %4551 = dma.vmem_to_hbm [thread:$0]  %s4549_s8, 448, %s6776_s13, [#allocation24]  }
 0x64e   :  { %6389 = dma.done.wait [#allocation4], 256  }
 0x64f   :  { %6390 = vsyncadd [#allocation4], 4294967040 }
 0x650   :  { %6391 = dma.done.wait [#allocation24], 448  }
 0x651   :  { %6392 = vsyncadd [#allocation24], 4294966848 }
 0x652   :  { %4558 = vsyncpa [#allocation3], 1 }
 0x653   :  { %4559 = vsyncpa [#allocation6], 1 }
 0x654   :  { %4560 = vsyncpa [#allocation9], 1 }
 0x655   :  { %4561 = vsyncpa [#allocation12], 1 }
 0x656   :  { %4562 = vsyncpa [#allocation15], 1 }
 0x657   :  { %4563 = vsyncpa [#allocation18], 1 }
 0x658   :  { %4564 = vsyncpa [#allocation21], 1 }
 0x659   :  { %4565 = vsyncpa [#allocation4], 1 }
 0x65a   :  { %4566 = vsyncpa [#allocation24], 1 }

</bundles_post_ra>
